<compile_context>
chip_gen: v7x
topology: tpu7x:2x2x1
jax: 0.10.0
libtpu: 0.0.40
codegen_flags: <defaults>
</compile_context>

<pallas_src>
import functools

import jax
import jax.numpy as jnp
from jax import lax
from jax.experimental import pallas as pl
from jax.experimental.pallas import tpu as pltpu


def _mha_kernel(x_ref, wq_ref, wkv_ref, wp_ref, bp_ref, o_ref, *,
                n_head, head_size, q_tile, compute_dtype):
    cdt = compute_dtype
    scale = head_size ** -0.5
    t_kv, c = x_ref.shape                                    # full sequence, embed dim

    x_full = x_ref[...].astype(cdt)                          # [T, C]  (keys/values)
    q_start = pl.multiple_of(pl.program_id(1) * q_tile, q_tile)
    x_q = x_ref[pl.ds(q_start, q_tile), :].astype(cdt)       # [Tq, C] (queries)

    # Fused, lane-dense projections (N = C and N = 2C keep the MXU columns full).
    q_all = jnp.dot(x_q, wq_ref[...].astype(cdt),
                    preferred_element_type=jnp.float32)       # [Tq, C]
    kv_all = jnp.dot(x_full, wkv_ref[...].astype(cdt),
                     preferred_element_type=jnp.float32)      # [T, 2C]

    # Causal mask on absolute query indices; finite negative (not -inf) so any padded
    # / fully-masked rows cannot produce exp(-inf - -inf) = NaN.
    rows = q_start + lax.broadcasted_iota(jnp.int32, (q_tile, t_kv), 0)
    cols = lax.broadcasted_iota(jnp.int32, (q_tile, t_kv), 1)
    causal = cols <= rows
    neg_big = jnp.float32(-1e30)

    # Accumulate head_out @ Wp[h] directly into one f32 [Tq, C] accumulator (replaces
    # concat + [C, C] projection); start from the projection bias.
    acc = jnp.broadcast_to(bp_ref[...].astype(jnp.float32), (q_tile, c))

    for h in range(n_head):          # n_head is a small Python constant -> unrolled;
        lo = h * head_size           # each head's intermediates die into `acc`.
        q_h = q_all[:, lo:lo + head_size].astype(cdt)
        k_h = kv_all[:, lo:lo + head_size].astype(cdt)
        v_h = kv_all[:, c + lo:c + lo + head_size].astype(cdt)

        # scores = q @ k^T  (contract head dim, no explicit transpose)
        s = lax.dot_general(q_h, k_h, (((1,), (1,)), ((), ())),
                            preferred_element_type=jnp.float32) * scale   # [Tq, T]
        s = jnp.where(causal, s, neg_big)

        # numerically stable softmax over keys, kept in f32 on every chip generation
        m = jnp.max(s, axis=-1, keepdims=True)
        p = jnp.exp(s - m)
        l = jnp.sum(p, axis=-1, keepdims=True)
        p = p * pl.reciprocal(l, approx=True)                 # EUP slot, ~free
        # TODO(synk): training-mode attention dropout (pltpu.prng_random_bits mask)
        # not implemented; forward matches PyTorch module.eval() semantics.

        out_h = jnp.dot(p.astype(cdt), v_h,
                        preferred_element_type=jnp.float32)   # [Tq, hs]
        acc = acc + jnp.dot(out_h.astype(cdt), wp_ref[h].astype(cdt),
                            preferred_element_type=jnp.float32)           # [Tq, C]

    # TODO(synk): training-mode output dropout not implemented (eval identity).
    o_ref[...] = acc.astype(o_ref.dtype)                      # lane-dense [Tq, C] store


def sequential_mha(x, wq_all, wkv, wp_heads, bp, *, q_tile=None,
                   compute_dtype=None, vmem_limit_bytes=None,
                   single_buffer_weights=True):
    """x: [B, T, C]; wq_all: [C, C]; wkv: [C, 2C]; wp_heads: [n_head, hs, C]; bp: [1, C]."""
    B, T, C = x.shape
    n_head, head_size, c_out = wp_heads.shape
    assert c_out == C and n_head * head_size == C
    assert wq_all.shape == (C, C) and wkv.shape == (C, 2 * C) and bp.shape == (1, C)

    if compute_dtype is None:
        compute_dtype = x.dtype                   # bf16 recommended for deployment
    if q_tile is None:
        q_tile = T if T <= 256 else 128
        if T % q_tile != 0:
            q_tile = T                            # fall back to untiled queries
    assert T % q_tile == 0
    n_q = T // q_tile

    kernel = functools.partial(_mha_kernel, n_head=n_head, head_size=head_size,
                               q_tile=q_tile, compute_dtype=compute_dtype)

    itemsize = jnp.dtype(x.dtype).itemsize
    # --- VMEM budget (explicit limit with headroom, valid on v7x's 64 MiB) ---
    w_bytes = (C * C + 2 * C * C + n_head * head_size * C + C) * itemsize
    io_bytes = 2 * (T * C + q_tile * C) * itemsize            # double-buffered x / out
    tmp_bytes = (q_tile * C + 2 * T * C + 2 * q_tile * T + 2 * q_tile * C) * 4
    est = 2 * w_bytes + io_bytes + tmp_bytes
    if vmem_limit_bytes is None:
        vmem_limit_bytes = int(min(max(2 * est, 32 << 20), 64 << 20))

    # --- advisory cost estimate for the XLA scheduler ---
    flops = B * n_q * (2 * q_tile * C * C                       # Q projection
                       + 2 * T * (2 * C) * C                    # K/V projections
                       + n_head * (2 * q_tile * T * head_size   # scores
                                   + 2 * q_tile * T * head_size # attn @ V
                                   + 2 * q_tile * head_size * C))  # per-head out proj
    transcendentals = B * n_q * n_head * q_tile * T
    bytes_accessed = int((B * T * C * 2) * itemsize
                         + (4 * C * C + C) * itemsize)
    cost = pl.CostEstimate(flops=flops, transcendentals=transcendentals,
                           bytes_accessed=bytes_accessed)

    def _build_and_call(single_buf):
        wkw = {"pipeline_mode": pl.Buffered(1)} if single_buf else {}
        in_specs = [
            pl.BlockSpec((None, T, C), lambda b, q: (b, 0, 0)),          # x (full seq)
            pl.BlockSpec((C, C), lambda b, q: (0, 0), **wkw),            # Wq_all
            pl.BlockSpec((C, 2 * C), lambda b, q: (0, 0), **wkw),        # Wk|Wv
            pl.BlockSpec((n_head, head_size, C), lambda b, q: (0, 0, 0), **wkw),  # Wp
            pl.BlockSpec((1, C), lambda b, q: (0, 0), **wkw),            # bias
        ]
        out_specs = pl.BlockSpec((None, q_tile, C), lambda b, q: (b, q, 0))
        return pl.pallas_call(
            kernel,
            out_shape=jax.ShapeDtypeStruct((B, T, C), x.dtype),
            grid_spec=pltpu.PrefetchScalarGridSpec(
                num_scalar_prefetch=0,
                grid=(B, n_q),
                in_specs=in_specs,
                out_specs=out_specs,
            ),
            compiler_params=pltpu.CompilerParams(
                dimension_semantics=("parallel", "parallel"),
                vmem_limit_bytes=vmem_limit_bytes),
            cost_estimate=cost,
        )(x, wq_all, wkv, wp_heads, bp)

    if single_buffer_weights:
        try:
            return _build_and_call(True)
        except Exception:  # older Pallas without Buffered(1)/pipeline_mode support
            pass
    return _build_and_call(False)


def init_params(key, n_embd, n_head, dtype=jnp.float32):
    """Deterministic init mimicking nn.Linear (uniform +/- 1/sqrt(fan_in)).

    Weights stored [in, out] (transposed vs PyTorch's [out, in]); per-head
    q/k/v weights stacked along a leading head axis (module layout).
    """
    head_size = n_embd // n_head
    kq, kk, kv, kpw, kpb = jax.random.split(key, 5)
    lim = 1.0 / (n_embd ** 0.5)
    wq = jax.random.uniform(kq, (n_head, n_embd, head_size), dtype, -lim, lim)
    wk = jax.random.uniform(kk, (n_head, n_embd, head_size), dtype, -lim, lim)
    wv = jax.random.uniform(kv, (n_head, n_embd, head_size), dtype, -lim, lim)
    wp = jax.random.uniform(kpw, (n_embd, n_embd), dtype, -lim, lim)
    bp = jax.random.uniform(kpb, (1, n_embd), dtype, -lim, lim)
    return wq, wk, wv, wp, bp


def pack_params(wq, wk, wv, wp, bp):
    """Host-side repack into the fused kernel layout."""
    n_head, C, hs = wq.shape
    wq_all = jnp.moveaxis(wq, 0, 1).reshape(C, n_head * hs)        # [C, C]
    wk_all = jnp.moveaxis(wk, 0, 1).reshape(C, n_head * hs)        # [C, C]
    wv_all = jnp.moveaxis(wv, 0, 1).reshape(C, n_head * hs)        # [C, C]
    wkv = jnp.concatenate([wk_all, wv_all], axis=1)                # [C, 2C]
    wp_heads = wp.reshape(n_head, hs, C)                           # [nh, hs, C]
    return wq_all, wkv, wp_heads, bp


def mha_reference(x, wq, wk, wv, wp, bp):
    """Plain-JAX reference (high-precision matmuls), mirrors the PyTorch module."""
    B, T, C = x.shape
    n_head, _, hs = wq.shape
    hp = jax.lax.Precision.HIGHEST
    mask = jnp.tril(jnp.ones((T, T), dtype=bool))
    outs = []
    for h in range(n_head):
        q = jnp.einsum("btc,ch->bth", x, wq[h], precision=hp)
        k = jnp.einsum("btc,ch->bth", x, wk[h], precision=hp)
        v = jnp.einsum("btc,ch->bth", x, wv[h], precision=hp)
        s = jnp.einsum("bth,bsh->bts", q, k, precision=hp) * (hs ** -0.5)
        s = jnp.where(mask, s, -jnp.inf)
        w = jax.nn.softmax(s, axis=-1)
        outs.append(jnp.einsum("bts,bsh->bth", w, v, precision=hp))
    cat = jnp.concatenate(outs, axis=-1)
    return jnp.einsum("btc,cd->btd", cat, wp, precision=hp) + bp


if __name__ == "__main__":
    key = jax.random.PRNGKey(0)
    B, T = 2, 8                  # batch, sequence length (== block_size)
    n_embd, n_head = 32, 4       # head_size = 8

    kx, kp = jax.random.split(key)
    x = jax.random.normal(kx, (B, T, n_embd), jnp.float32)
    wq, wk, wv, wp, bp = init_params(kp, n_embd, n_head)
    wq_all, wkv, wp_heads, bp_packed = pack_params(wq, wk, wv, wp, bp)

    # f32 path: matches the PyTorch (eval) module numerics.
    out = sequential_mha(x, wq_all, wkv, wp_heads, bp_packed)
    out = jax.block_until_ready(out)

    ref = mha_reference(x, wq, wk, wv, wp, bp)
    assert out.shape == (B, T, n_embd)
    max_err = float(jnp.max(jnp.abs(out - ref)))
    assert jnp.allclose(out, ref, atol=3e-3, rtol=3e-3), f"max_err={max_err}"

    # bf16 MXU path (deployment config): same kernel, operands cast to bf16.
    out_bf16 = sequential_mha(x, wq_all, wkv, wp_heads, bp_packed,
                              compute_dtype=jnp.bfloat16)
    out_bf16 = jax.block_until_ready(out_bf16)
    max_err_bf16 = float(jnp.max(jnp.abs(out_bf16.astype(jnp.float32) - ref)))
    assert max_err_bf16 < 1e-1, f"bf16 max_err={max_err_bf16}"

    print("KERNEL_OK")
</pallas_src>

<mosaic_0001>
module attributes {stable_mosaic.version = 11 : i64} {
  func.func @_mha_kernel(%arg0: i32, %arg1: i32, %arg2: memref<1x8x32xf32, #tpu.memory_space<vmem>>, %arg3: memref<32x32xf32, #tpu.memory_space<vmem>>, %arg4: memref<32x64xf32, #tpu.memory_space<vmem>>, %arg5: memref<4x8x32xf32, #tpu.memory_space<vmem>>, %arg6: memref<1x32xf32, #tpu.memory_space<vmem>>, %arg7: memref<1x8x32xf32, #tpu.memory_space<vmem>>) attributes {dimension_semantics = [#tpu.dimension_semantics<parallel>, #tpu.dimension_semantics<parallel>], iteration_bounds = array<i64: 2, 1>, scalar_prefetch = 0 : i64, scratch_operands = 0 : i64, tpu.core_type = #tpu.core_type<tc>, window_params = [{transform_indices = @transform_0, window_bounds = array<i64: 1, 8, 32>}, {pipeline_mode = #tpu.pipeline_mode<synchronous>, transform_indices = @transform_1, window_bounds = array<i64: 32, 32>}, {pipeline_mode = #tpu.pipeline_mode<synchronous>, transform_indices = @transform_2, window_bounds = array<i64: 32, 64>}, {pipeline_mode = #tpu.pipeline_mode<synchronous>, transform_indices = @transform_3, window_bounds = array<i64: 4, 8, 32>}, {pipeline_mode = #tpu.pipeline_mode<synchronous>, transform_indices = @transform_4, window_bounds = array<i64: 1, 32>}, {transform_indices = @transform_5, window_bounds = array<i64: 1, 8, 32>}]} {
    %c0 = arith.constant 0 : index
    %c0_0 = arith.constant 0 : index
    %c0_1 = arith.constant 0 : index
    %0 = vector.load %arg2[%c0, %c0_0, %c0_1] : memref<1x8x32xf32, #tpu.memory_space<vmem>>, vector<1x8x32xf32>
    %1 = vector.shape_cast %0 : vector<1x8x32xf32> to vector<8x32xf32>
    %c8_i32 = arith.constant 8 : i32
    %2 = arith.muli %arg1, %c8_i32 : i32
    %3 = tpu.assume_multiple %2, 8 : i32
    %c0_2 = arith.constant 0 : index
    %4 = arith.index_cast %3 : i32 to index
    %c0_3 = arith.constant 0 : index
    %5 = vector.load %arg2[%c0_2, %4, %c0_3] : memref<1x8x32xf32, #tpu.memory_space<vmem>>, vector<1x8x32xf32>
    %6 = vector.shape_cast %5 : vector<1x8x32xf32> to vector<8x32xf32>
    %c0_4 = arith.constant 0 : index
    %c0_5 = arith.constant 0 : index
    %7 = vector.load %arg3[%c0_4, %c0_5] : memref<32x32xf32, #tpu.memory_space<vmem>>, vector<32x32xf32>
    %cst = arith.constant dense<0.000000e+00> : vector<8x32xf32>
    %8 = tpu.matmul %6, %7, %cst {dimension_numbers = #tpu.dot_dimension_numbers<[1], [0], [0], [1], [0, 0, 1, 1], [], []>} : vector<8x32xf32>, vector<32x32xf32>, vector<8x32xf32> -> vector<8x32xf32>
    %c0_6 = arith.constant 0 : index
    %c0_7 = arith.constant 0 : index
    %9 = vector.load %arg4[%c0_6, %c0_7] : memref<32x64xf32, #tpu.memory_space<vmem>>, vector<32x64xf32>
    %cst_8 = arith.constant dense<0.000000e+00> : vector<8x64xf32>
    %10 = tpu.matmul %1, %9, %cst_8 {dimension_numbers = #tpu.dot_dimension_numbers<[1], [0], [0], [1], [0, 0, 1, 1], [], []>} : vector<8x32xf32>, vector<32x64xf32>, vector<8x64xf32> -> vector<8x64xf32>
    %11 = tpu.iota {dimensions = array<i32: 0>} : vector<8x8xi32>
    %12 = vector.broadcast %3 : i32 to vector<8x8xi32>
    %13 = arith.addi %12, %11 : vector<8x8xi32>
    %14 = tpu.iota {dimensions = array<i32: 1>} : vector<8x8xi32>
    %15 = arith.cmpi sle, %14, %13 : vector<8x8xi32>
    %c0_9 = arith.constant 0 : index
    %c0_10 = arith.constant 0 : index
    %16 = vector.load %arg6[%c0_9, %c0_10] : memref<1x32xf32, #tpu.memory_space<vmem>>, vector<1x32xf32>
    %17 = vector.shape_cast %16 : vector<1x32xf32> to vector<1x32xf32>
    %18 = vector.broadcast %17 : vector<1x32xf32> to vector<8x32xf32>
    %19 = vector.extract_strided_slice %8 {offsets = [0, 0], sizes = [8, 8], strides = [1, 1]} : vector<8x32xf32> to vector<8x8xf32>
    %20 = vector.extract_strided_slice %10 {offsets = [0, 0], sizes = [8, 8], strides = [1, 1]} : vector<8x64xf32> to vector<8x8xf32>
    %21 = vector.extract_strided_slice %10 {offsets = [0, 32], sizes = [8, 8], strides = [1, 1]} : vector<8x64xf32> to vector<8x8xf32>
    %cst_11 = arith.constant dense<0.000000e+00> : vector<8x8xf32>
    %22 = tpu.matmul %19, %20, %cst_11 {dimension_numbers = #tpu.dot_dimension_numbers<[1], [1], [0], [0], [0, 0, 1, 0], [], []>} : vector<8x8xf32>, vector<8x8xf32>, vector<8x8xf32> -> vector<8x8xf32>
    %cst_12 = arith.constant 0.353553385 : f32
    %23 = vector.broadcast %cst_12 : f32 to vector<8x8xf32>
    %24 = arith.mulf %22, %23 : vector<8x8xf32>
    %cst_13 = arith.constant -1.000000e+30 : f32
    %25 = vector.broadcast %cst_13 : f32 to vector<8x8xf32>
    %26 = arith.select %15, %24, %25 : vector<8x8xi1>, vector<8x8xf32>
    %cst_14 = arith.constant dense<0xFF800000> : vector<8xf32>
    %27 = vector.multi_reduction <maximumf>, %26, %cst_14 [1] : vector<8x8xf32> to vector<8xf32>
    %28 = vector.shape_cast %27 : vector<8xf32> to vector<8x1xf32>
    %29 = vector.broadcast %28 : vector<8x1xf32> to vector<8x8xf32>
    %30 = arith.subf %26, %29 : vector<8x8xf32>
    %31 = math.exp %30 : vector<8x8xf32>
    %cst_15 = arith.constant dense<0.000000e+00> : vector<8xf32>
    %32 = vector.multi_reduction <add>, %31, %cst_15 [1] : vector<8x8xf32> to vector<8xf32>
    %33 = vector.shape_cast %32 : vector<8xf32> to vector<8x1xf32>
    %34 = tpu.reciprocal %33 {approx = true} : vector<8x1xf32> -> vector<8x1xf32>
    %35 = vector.broadcast %34 : vector<8x1xf32> to vector<8x8xf32>
    %36 = arith.mulf %31, %35 : vector<8x8xf32>
    %cst_16 = arith.constant dense<0.000000e+00> : vector<8x8xf32>
    %37 = tpu.matmul %36, %21, %cst_16 {dimension_numbers = #tpu.dot_dimension_numbers<[1], [0], [0], [1], [0, 0, 1, 1], [], []>} : vector<8x8xf32>, vector<8x8xf32>, vector<8x8xf32> -> vector<8x8xf32>
    %c0_17 = arith.constant 0 : index
    %c0_18 = arith.constant 0 : index
    %c0_19 = arith.constant 0 : index
    %38 = vector.load %arg5[%c0_17, %c0_18, %c0_19] : memref<4x8x32xf32, #tpu.memory_space<vmem>>, vector<1x8x32xf32>
    %39 = vector.shape_cast %38 : vector<1x8x32xf32> to vector<8x32xf32>
    %cst_20 = arith.constant dense<0.000000e+00> : vector<8x32xf32>
    %40 = tpu.matmul %37, %39, %cst_20 {dimension_numbers = #tpu.dot_dimension_numbers<[1], [0], [0], [1], [0, 0, 1, 1], [], []>} : vector<8x8xf32>, vector<8x32xf32>, vector<8x32xf32> -> vector<8x32xf32>
    %41 = arith.addf %18, %40 : vector<8x32xf32>
    %42 = vector.extract_strided_slice %8 {offsets = [0, 8], sizes = [8, 8], strides = [1, 1]} : vector<8x32xf32> to vector<8x8xf32>
    %43 = vector.extract_strided_slice %10 {offsets = [0, 8], sizes = [8, 8], strides = [1, 1]} : vector<8x64xf32> to vector<8x8xf32>
    %44 = vector.extract_strided_slice %10 {offsets = [0, 40], sizes = [8, 8], strides = [1, 1]} : vector<8x64xf32> to vector<8x8xf32>
    %cst_21 = arith.constant dense<0.000000e+00> : vector<8x8xf32>
    %45 = tpu.matmul %42, %43, %cst_21 {dimension_numbers = #tpu.dot_dimension_numbers<[1], [1], [0], [0], [0, 0, 1, 0], [], []>} : vector<8x8xf32>, vector<8x8xf32>, vector<8x8xf32> -> vector<8x8xf32>
    %cst_22 = arith.constant 0.353553385 : f32
    %46 = vector.broadcast %cst_22 : f32 to vector<8x8xf32>
    %47 = arith.mulf %45, %46 : vector<8x8xf32>
    %cst_23 = arith.constant -1.000000e+30 : f32
    %48 = vector.broadcast %cst_23 : f32 to vector<8x8xf32>
    %49 = arith.select %15, %47, %48 : vector<8x8xi1>, vector<8x8xf32>
    %cst_24 = arith.constant dense<0xFF800000> : vector<8xf32>
    %50 = vector.multi_reduction <maximumf>, %49, %cst_24 [1] : vector<8x8xf32> to vector<8xf32>
    %51 = vector.shape_cast %50 : vector<8xf32> to vector<8x1xf32>
    %52 = vector.broadcast %51 : vector<8x1xf32> to vector<8x8xf32>
    %53 = arith.subf %49, %52 : vector<8x8xf32>
    %54 = math.exp %53 : vector<8x8xf32>
    %cst_25 = arith.constant dense<0.000000e+00> : vector<8xf32>
    %55 = vector.multi_reduction <add>, %54, %cst_25 [1] : vector<8x8xf32> to vector<8xf32>
    %56 = vector.shape_cast %55 : vector<8xf32> to vector<8x1xf32>
    %57 = tpu.reciprocal %56 {approx = true} : vector<8x1xf32> -> vector<8x1xf32>
    %58 = vector.broadcast %57 : vector<8x1xf32> to vector<8x8xf32>
    %59 = arith.mulf %54, %58 : vector<8x8xf32>
    %cst_26 = arith.constant dense<0.000000e+00> : vector<8x8xf32>
    %60 = tpu.matmul %59, %44, %cst_26 {dimension_numbers = #tpu.dot_dimension_numbers<[1], [0], [0], [1], [0, 0, 1, 1], [], []>} : vector<8x8xf32>, vector<8x8xf32>, vector<8x8xf32> -> vector<8x8xf32>
    %c1 = arith.constant 1 : index
    %c0_27 = arith.constant 0 : index
    %c0_28 = arith.constant 0 : index
    %61 = vector.load %arg5[%c1, %c0_27, %c0_28] : memref<4x8x32xf32, #tpu.memory_space<vmem>>, vector<1x8x32xf32>
    %62 = vector.shape_cast %61 : vector<1x8x32xf32> to vector<8x32xf32>
    %cst_29 = arith.constant dense<0.000000e+00> : vector<8x32xf32>
    %63 = tpu.matmul %60, %62, %cst_29 {dimension_numbers = #tpu.dot_dimension_numbers<[1], [0], [0], [1], [0, 0, 1, 1], [], []>} : vector<8x8xf32>, vector<8x32xf32>, vector<8x32xf32> -> vector<8x32xf32>
    %64 = arith.addf %41, %63 : vector<8x32xf32>
    %65 = vector.extract_strided_slice %8 {offsets = [0, 16], sizes = [8, 8], strides = [1, 1]} : vector<8x32xf32> to vector<8x8xf32>
    %66 = vector.extract_strided_slice %10 {offsets = [0, 16], sizes = [8, 8], strides = [1, 1]} : vector<8x64xf32> to vector<8x8xf32>
    %67 = vector.extract_strided_slice %10 {offsets = [0, 48], sizes = [8, 8], strides = [1, 1]} : vector<8x64xf32> to vector<8x8xf32>
    %cst_30 = arith.constant dense<0.000000e+00> : vector<8x8xf32>
    %68 = tpu.matmul %65, %66, %cst_30 {dimension_numbers = #tpu.dot_dimension_numbers<[1], [1], [0], [0], [0, 0, 1, 0], [], []>} : vector<8x8xf32>, vector<8x8xf32>, vector<8x8xf32> -> vector<8x8xf32>
    %cst_31 = arith.constant 0.353553385 : f32
    %69 = vector.broadcast %cst_31 : f32 to vector<8x8xf32>
    %70 = arith.mulf %68, %69 : vector<8x8xf32>
    %cst_32 = arith.constant -1.000000e+30 : f32
    %71 = vector.broadcast %cst_32 : f32 to vector<8x8xf32>
    %72 = arith.select %15, %70, %71 : vector<8x8xi1>, vector<8x8xf32>
    %cst_33 = arith.constant dense<0xFF800000> : vector<8xf32>
    %73 = vector.multi_reduction <maximumf>, %72, %cst_33 [1] : vector<8x8xf32> to vector<8xf32>
    %74 = vector.shape_cast %73 : vector<8xf32> to vector<8x1xf32>
    %75 = vector.broadcast %74 : vector<8x1xf32> to vector<8x8xf32>
    %76 = arith.subf %72, %75 : vector<8x8xf32>
    %77 = math.exp %76 : vector<8x8xf32>
    %cst_34 = arith.constant dense<0.000000e+00> : vector<8xf32>
    %78 = vector.multi_reduction <add>, %77, %cst_34 [1] : vector<8x8xf32> to vector<8xf32>
    %79 = vector.shape_cast %78 : vector<8xf32> to vector<8x1xf32>
    %80 = tpu.reciprocal %79 {approx = true} : vector<8x1xf32> -> vector<8x1xf32>
    %81 = vector.broadcast %80 : vector<8x1xf32> to vector<8x8xf32>
    %82 = arith.mulf %77, %81 : vector<8x8xf32>
    %cst_35 = arith.constant dense<0.000000e+00> : vector<8x8xf32>
    %83 = tpu.matmul %82, %67, %cst_35 {dimension_numbers = #tpu.dot_dimension_numbers<[1], [0], [0], [1], [0, 0, 1, 1], [], []>} : vector<8x8xf32>, vector<8x8xf32>, vector<8x8xf32> -> vector<8x8xf32>
    %c2 = arith.constant 2 : index
    %c0_36 = arith.constant 0 : index
    %c0_37 = arith.constant 0 : index
    %84 = vector.load %arg5[%c2, %c0_36, %c0_37] : memref<4x8x32xf32, #tpu.memory_space<vmem>>, vector<1x8x32xf32>
    %85 = vector.shape_cast %84 : vector<1x8x32xf32> to vector<8x32xf32>
    %cst_38 = arith.constant dense<0.000000e+00> : vector<8x32xf32>
    %86 = tpu.matmul %83, %85, %cst_38 {dimension_numbers = #tpu.dot_dimension_numbers<[1], [0], [0], [1], [0, 0, 1, 1], [], []>} : vector<8x8xf32>, vector<8x32xf32>, vector<8x32xf32> -> vector<8x32xf32>
    %87 = arith.addf %64, %86 : vector<8x32xf32>
    %88 = vector.extract_strided_slice %8 {offsets = [0, 24], sizes = [8, 8], strides = [1, 1]} : vector<8x32xf32> to vector<8x8xf32>
    %89 = vector.extract_strided_slice %10 {offsets = [0, 24], sizes = [8, 8], strides = [1, 1]} : vector<8x64xf32> to vector<8x8xf32>
    %90 = vector.extract_strided_slice %10 {offsets = [0, 56], sizes = [8, 8], strides = [1, 1]} : vector<8x64xf32> to vector<8x8xf32>
    %cst_39 = arith.constant dense<0.000000e+00> : vector<8x8xf32>
    %91 = tpu.matmul %88, %89, %cst_39 {dimension_numbers = #tpu.dot_dimension_numbers<[1], [1], [0], [0], [0, 0, 1, 0], [], []>} : vector<8x8xf32>, vector<8x8xf32>, vector<8x8xf32> -> vector<8x8xf32>
    %cst_40 = arith.constant 0.353553385 : f32
    %92 = vector.broadcast %cst_40 : f32 to vector<8x8xf32>
    %93 = arith.mulf %91, %92 : vector<8x8xf32>
    %cst_41 = arith.constant -1.000000e+30 : f32
    %94 = vector.broadcast %cst_41 : f32 to vector<8x8xf32>
    %95 = arith.select %15, %93, %94 : vector<8x8xi1>, vector<8x8xf32>
    %cst_42 = arith.constant dense<0xFF800000> : vector<8xf32>
    %96 = vector.multi_reduction <maximumf>, %95, %cst_42 [1] : vector<8x8xf32> to vector<8xf32>
    %97 = vector.shape_cast %96 : vector<8xf32> to vector<8x1xf32>
    %98 = vector.broadcast %97 : vector<8x1xf32> to vector<8x8xf32>
    %99 = arith.subf %95, %98 : vector<8x8xf32>
    %100 = math.exp %99 : vector<8x8xf32>
    %cst_43 = arith.constant dense<0.000000e+00> : vector<8xf32>
    %101 = vector.multi_reduction <add>, %100, %cst_43 [1] : vector<8x8xf32> to vector<8xf32>
    %102 = vector.shape_cast %101 : vector<8xf32> to vector<8x1xf32>
    %103 = tpu.reciprocal %102 {approx = true} : vector<8x1xf32> -> vector<8x1xf32>
    %104 = vector.broadcast %103 : vector<8x1xf32> to vector<8x8xf32>
    %105 = arith.mulf %100, %104 : vector<8x8xf32>
    %cst_44 = arith.constant dense<0.000000e+00> : vector<8x8xf32>
    %106 = tpu.matmul %105, %90, %cst_44 {dimension_numbers = #tpu.dot_dimension_numbers<[1], [0], [0], [1], [0, 0, 1, 1], [], []>} : vector<8x8xf32>, vector<8x8xf32>, vector<8x8xf32> -> vector<8x8xf32>
    %c3 = arith.constant 3 : index
    %c0_45 = arith.constant 0 : index
    %c0_46 = arith.constant 0 : index
    %107 = vector.load %arg5[%c3, %c0_45, %c0_46] : memref<4x8x32xf32, #tpu.memory_space<vmem>>, vector<1x8x32xf32>
    %108 = vector.shape_cast %107 : vector<1x8x32xf32> to vector<8x32xf32>
    %cst_47 = arith.constant dense<0.000000e+00> : vector<8x32xf32>
    %109 = tpu.matmul %106, %108, %cst_47 {dimension_numbers = #tpu.dot_dimension_numbers<[1], [0], [0], [1], [0, 0, 1, 1], [], []>} : vector<8x8xf32>, vector<8x32xf32>, vector<8x32xf32> -> vector<8x32xf32>
    %110 = arith.addf %87, %109 : vector<8x32xf32>
    %c0_48 = arith.constant 0 : index
    %c0_49 = arith.constant 0 : index
    %c0_50 = arith.constant 0 : index
    %111 = vector.load %arg7[%c0_48, %c0_49, %c0_50] : memref<1x8x32xf32, #tpu.memory_space<vmem>>, vector<1x8x32xf32>
    %112 = vector.shape_cast %111 : vector<1x8x32xf32> to vector<8x32xf32>
    %113 = vector.shape_cast %110 : vector<8x32xf32> to vector<1x8x32xf32>
    tpu.vector_store %arg7[%c0_48, %c0_49, %c0_50], %113 {strides = array<i32>} : memref<1x8x32xf32, #tpu.memory_space<vmem>>, vector<1x8x32xf32>,
    return
  }
  func.func @transform_0(%arg0: i32, %arg1: i32) -> (i32, i32, i32) {
    %c0_i32 = arith.constant 0 : i32
    %c0_i32_0 = arith.constant 0 : i32
    %c0_i32_1 = arith.constant 0 : i32
    return %arg0, %c0_i32, %c0_i32_0 : i32, i32, i32
  }
  func.func @transform_1(%arg0: i32, %arg1: i32) -> (i32, i32) {
    %c0_i32 = arith.constant 0 : i32
    %c0_i32_0 = arith.constant 0 : i32
    %c0_i32_1 = arith.constant 0 : i32
    return %c0_i32, %c0_i32_0 : i32, i32
  }
  func.func @transform_2(%arg0: i32, %arg1: i32) -> (i32, i32) {
    %c0_i32 = arith.constant 0 : i32
    %c0_i32_0 = arith.constant 0 : i32
    %c0_i32_1 = arith.constant 0 : i32
    return %c0_i32, %c0_i32_0 : i32, i32
  }
  func.func @transform_3(%arg0: i32, %arg1: i32) -> (i32, i32, i32) {
    %c0_i32 = arith.constant 0 : i32
    %c0_i32_0 = arith.constant 0 : i32
    %c0_i32_1 = arith.constant 0 : i32
    %c0_i32_2 = arith.constant 0 : i32
    return %c0_i32, %c0_i32_0, %c0_i32_1 : i32, i32, i32
  }
  func.func @transform_4(%arg0: i32, %arg1: i32) -> (i32, i32) {
    %c0_i32 = arith.constant 0 : i32
    %c0_i32_0 = arith.constant 0 : i32
    %c0_i32_1 = arith.constant 0 : i32
    return %c0_i32, %c0_i32_0 : i32, i32
  }
  func.func @transform_5(%arg0: i32, %arg1: i32) -> (i32, i32, i32) {
    %c0_i32 = arith.constant 0 : i32
    %c0_i32_0 = arith.constant 0 : i32
    return %arg0, %arg1, %c0_i32 : i32, i32, i32
  }
}

module attributes {stable_mosaic.version = 11 : i64} {
  func.func @_mha_kernel(%arg0: i32, %arg1: i32, %arg2: memref<1x8x32xf32, #tpu.memory_space<vmem>>, %arg3: memref<32x32xf32, #tpu.memory_space<vmem>>, %arg4: memref<32x64xf32, #tpu.memory_space<vmem>>, %arg5: memref<4x8x32xf32, #tpu.memory_space<vmem>>, %arg6: memref<1x32xf32, #tpu.memory_space<vmem>>, %arg7: memref<1x8x32xf32, #tpu.memory_space<vmem>>) attributes {dimension_semantics = [#tpu.dimension_semantics<parallel>, #tpu.dimension_semantics<parallel>], iteration_bounds = array<i64: 2, 1>, scalar_prefetch = 0 : i64, scratch_operands = 0 : i64, tpu.core_type = #tpu.core_type<tc>, window_params = [{transform_indices = @transform_0, window_bounds = array<i64: 1, 8, 32>}, {pipeline_mode = #tpu.pipeline_mode<synchronous>, transform_indices = @transform_1, window_bounds = array<i64: 32, 32>}, {pipeline_mode = #tpu.pipeline_mode<synchronous>, transform_indices = @transform_2, window_bounds = array<i64: 32, 64>}, {pipeline_mode = #tpu.pipeline_mode<synchronous>, transform_indices = @transform_3, window_bounds = array<i64: 4, 8, 32>}, {pipeline_mode = #tpu.pipeline_mode<synchronous>, transform_indices = @transform_4, window_bounds = array<i64: 1, 32>}, {transform_indices = @transform_5, window_bounds = array<i64: 1, 8, 32>}]} {
    %c0 = arith.constant 0 : index
    %c0_0 = arith.constant 0 : index
    %c0_1 = arith.constant 0 : index
    %0 = vector.load %arg2[%c0, %c0_0, %c0_1] : memref<1x8x32xf32, #tpu.memory_space<vmem>>, vector<1x8x32xf32>
    %1 = vector.shape_cast %0 : vector<1x8x32xf32> to vector<8x32xf32>
    %c8_i32 = arith.constant 8 : i32
    %2 = arith.muli %arg1, %c8_i32 : i32
    %3 = tpu.assume_multiple %2, 8 : i32
    %c0_2 = arith.constant 0 : index
    %4 = arith.index_cast %3 : i32 to index
    %c0_3 = arith.constant 0 : index
    %5 = vector.load %arg2[%c0_2, %4, %c0_3] : memref<1x8x32xf32, #tpu.memory_space<vmem>>, vector<1x8x32xf32>
    %6 = vector.shape_cast %5 : vector<1x8x32xf32> to vector<8x32xf32>
    %c0_4 = arith.constant 0 : index
    %c0_5 = arith.constant 0 : index
    %7 = vector.load %arg3[%c0_4, %c0_5] : memref<32x32xf32, #tpu.memory_space<vmem>>, vector<32x32xf32>
    %cst = arith.constant dense<0.000000e+00> : vector<8x32xf32>
    %8 = tpu.matmul %6, %7, %cst {dimension_numbers = #tpu.dot_dimension_numbers<[1], [0], [0], [1], [0, 0, 1, 1], [], []>} : vector<8x32xf32>, vector<32x32xf32>, vector<8x32xf32> -> vector<8x32xf32>
    %c0_6 = arith.constant 0 : index
    %c0_7 = arith.constant 0 : index
    %9 = vector.load %arg4[%c0_6, %c0_7] : memref<32x64xf32, #tpu.memory_space<vmem>>, vector<32x64xf32>
    %cst_8 = arith.constant dense<0.000000e+00> : vector<8x64xf32>
    %10 = tpu.matmul %1, %9, %cst_8 {dimension_numbers = #tpu.dot_dimension_numbers<[1], [0], [0], [1], [0, 0, 1, 1], [], []>} : vector<8x32xf32>, vector<32x64xf32>, vector<8x64xf32> -> vector<8x64xf32>
    %11 = tpu.iota {dimensions = array<i32: 0>} : vector<8x8xi32>
    %12 = vector.broadcast %3 : i32 to vector<8x8xi32>
    %13 = arith.addi %12, %11 : vector<8x8xi32>
    %14 = tpu.iota {dimensions = array<i32: 1>} : vector<8x8xi32>
    %15 = arith.cmpi sle, %14, %13 : vector<8x8xi32>
    %c0_9 = arith.constant 0 : index
    %c0_10 = arith.constant 0 : index
    %16 = vector.load %arg6[%c0_9, %c0_10] : memref<1x32xf32, #tpu.memory_space<vmem>>, vector<1x32xf32>
    %17 = vector.shape_cast %16 : vector<1x32xf32> to vector<1x32xf32>
    %18 = vector.broadcast %17 : vector<1x32xf32> to vector<8x32xf32>
    %19 = vector.extract_strided_slice %8 {offsets = [0, 0], sizes = [8, 8], strides = [1, 1]} : vector<8x32xf32> to vector<8x8xf32>
    %20 = vector.extract_strided_slice %10 {offsets = [0, 0], sizes = [8, 8], strides = [1, 1]} : vector<8x64xf32> to vector<8x8xf32>
    %21 = vector.extract_strided_slice %10 {offsets = [0, 32], sizes = [8, 8], strides = [1, 1]} : vector<8x64xf32> to vector<8x8xf32>
    %cst_11 = arith.constant dense<0.000000e+00> : vector<8x8xf32>
    %22 = tpu.matmul %19, %20, %cst_11 {dimension_numbers = #tpu.dot_dimension_numbers<[1], [1], [0], [0], [0, 0, 1, 0], [], []>} : vector<8x8xf32>, vector<8x8xf32>, vector<8x8xf32> -> vector<8x8xf32>
    %cst_12 = arith.constant 0.353553385 : f32
    %23 = vector.broadcast %cst_12 : f32 to vector<8x8xf32>
    %24 = arith.mulf %22, %23 : vector<8x8xf32>
    %cst_13 = arith.constant -1.000000e+30 : f32
    %25 = vector.broadcast %cst_13 : f32 to vector<8x8xf32>
    %26 = arith.select %15, %24, %25 : vector<8x8xi1>, vector<8x8xf32>
    %cst_14 = arith.constant dense<0xFF800000> : vector<8xf32>
    %27 = vector.multi_reduction <maximumf>, %26, %cst_14 [1] : vector<8x8xf32> to vector<8xf32>
    %28 = vector.shape_cast %27 : vector<8xf32> to vector<8x1xf32>
    %29 = vector.broadcast %28 : vector<8x1xf32> to vector<8x8xf32>
    %30 = arith.subf %26, %29 : vector<8x8xf32>
    %31 = math.exp %30 : vector<8x8xf32>
    %cst_15 = arith.constant dense<0.000000e+00> : vector<8xf32>
    %32 = vector.multi_reduction <add>, %31, %cst_15 [1] : vector<8x8xf32> to vector<8xf32>
    %33 = vector.shape_cast %32 : vector<8xf32> to vector<8x1xf32>
    %34 = tpu.reciprocal %33 {approx = true} : vector<8x1xf32> -> vector<8x1xf32>
    %35 = vector.broadcast %34 : vector<8x1xf32> to vector<8x8xf32>
    %36 = arith.mulf %31, %35 : vector<8x8xf32>
    %cst_16 = arith.constant dense<0.000000e+00> : vector<8x8xf32>
    %37 = tpu.matmul %36, %21, %cst_16 {dimension_numbers = #tpu.dot_dimension_numbers<[1], [0], [0], [1], [0, 0, 1, 1], [], []>} : vector<8x8xf32>, vector<8x8xf32>, vector<8x8xf32> -> vector<8x8xf32>
    %c0_17 = arith.constant 0 : index
    %c0_18 = arith.constant 0 : index
    %c0_19 = arith.constant 0 : index
    %38 = vector.load %arg5[%c0_17, %c0_18, %c0_19] : memref<4x8x32xf32, #tpu.memory_space<vmem>>, vector<1x8x32xf32>
    %39 = vector.shape_cast %38 : vector<1x8x32xf32> to vector<8x32xf32>
    %cst_20 = arith.constant dense<0.000000e+00> : vector<8x32xf32>
    %40 = tpu.matmul %37, %39, %cst_20 {dimension_numbers = #tpu.dot_dimension_numbers<[1], [0], [0], [1], [0, 0, 1, 1], [], []>} : vector<8x8xf32>, vector<8x32xf32>, vector<8x32xf32> -> vector<8x32xf32>
    %41 = arith.addf %18, %40 : vector<8x32xf32>
    %42 = vector.extract_strided_slice %8 {offsets = [0, 8], sizes = [8, 8], strides = [1, 1]} : vector<8x32xf32> to vector<8x8xf32>
    %43 = vector.extract_strided_slice %10 {offsets = [0, 8], sizes = [8, 8], strides = [1, 1]} : vector<8x64xf32> to vector<8x8xf32>
    %44 = vector.extract_strided_slice %10 {offsets = [0, 40], sizes = [8, 8], strides = [1, 1]} : vector<8x64xf32> to vector<8x8xf32>
    %cst_21 = arith.constant dense<0.000000e+00> : vector<8x8xf32>
    %45 = tpu.matmul %42, %43, %cst_21 {dimension_numbers = #tpu.dot_dimension_numbers<[1], [1], [0], [0], [0, 0, 1, 0], [], []>} : vector<8x8xf32>, vector<8x8xf32>, vector<8x8xf32> -> vector<8x8xf32>
    %cst_22 = arith.constant 0.353553385 : f32
    %46 = vector.broadcast %cst_22 : f32 to vector<8x8xf32>
    %47 = arith.mulf %45, %46 : vector<8x8xf32>
    %cst_23 = arith.constant -1.000000e+30 : f32
    %48 = vector.broadcast %cst_23 : f32 to vector<8x8xf32>
    %49 = arith.select %15, %47, %48 : vector<8x8xi1>, vector<8x8xf32>
    %cst_24 = arith.constant dense<0xFF800000> : vector<8xf32>
    %50 = vector.multi_reduction <maximumf>, %49, %cst_24 [1] : vector<8x8xf32> to vector<8xf32>
    %51 = vector.shape_cast %50 : vector<8xf32> to vector<8x1xf32>
    %52 = vector.broadcast %51 : vector<8x1xf32> to vector<8x8xf32>
    %53 = arith.subf %49, %52 : vector<8x8xf32>
    %54 = math.exp %53 : vector<8x8xf32>
    %cst_25 = arith.constant dense<0.000000e+00> : vector<8xf32>
    %55 = vector.multi_reduction <add>, %54, %cst_25 [1] : vector<8x8xf32> to vector<8xf32>
    %56 = vector.shape_cast %55 : vector<8xf32> to vector<8x1xf32>
    %57 = tpu.reciprocal %56 {approx = true} : vector<8x1xf32> -> vector<8x1xf32>
    %58 = vector.broadcast %57 : vector<8x1xf32> to vector<8x8xf32>
    %59 = arith.mulf %54, %58 : vector<8x8xf32>
    %cst_26 = arith.constant dense<0.000000e+00> : vector<8x8xf32>
    %60 = tpu.matmul %59, %44, %cst_26 {dimension_numbers = #tpu.dot_dimension_numbers<[1], [0], [0], [1], [0, 0, 1, 1], [], []>} : vector<8x8xf32>, vector<8x8xf32>, vector<8x8xf32> -> vector<8x8xf32>
    %c1 = arith.constant 1 : index
    %c0_27 = arith.constant 0 : index
    %c0_28 = arith.constant 0 : index
    %61 = vector.load %arg5[%c1, %c0_27, %c0_28] : memref<4x8x32xf32, #tpu.memory_space<vmem>>, vector<1x8x32xf32>
    %62 = vector.shape_cast %61 : vector<1x8x32xf32> to vector<8x32xf32>
    %cst_29 = arith.constant dense<0.000000e+00> : vector<8x32xf32>
    %63 = tpu.matmul %60, %62, %cst_29 {dimension_numbers = #tpu.dot_dimension_numbers<[1], [0], [0], [1], [0, 0, 1, 1], [], []>} : vector<8x8xf32>, vector<8x32xf32>, vector<8x32xf32> -> vector<8x32xf32>
    %64 = arith.addf %41, %63 : vector<8x32xf32>
    %65 = vector.extract_strided_slice %8 {offsets = [0, 16], sizes = [8, 8], strides = [1, 1]} : vector<8x32xf32> to vector<8x8xf32>
    %66 = vector.extract_strided_slice %10 {offsets = [0, 16], sizes = [8, 8], strides = [1, 1]} : vector<8x64xf32> to vector<8x8xf32>
    %67 = vector.extract_strided_slice %10 {offsets = [0, 48], sizes = [8, 8], strides = [1, 1]} : vector<8x64xf32> to vector<8x8xf32>
    %cst_30 = arith.constant dense<0.000000e+00> : vector<8x8xf32>
    %68 = tpu.matmul %65, %66, %cst_30 {dimension_numbers = #tpu.dot_dimension_numbers<[1], [1], [0], [0], [0, 0, 1, 0], [], []>} : vector<8x8xf32>, vector<8x8xf32>, vector<8x8xf32> -> vector<8x8xf32>
    %cst_31 = arith.constant 0.353553385 : f32
    %69 = vector.broadcast %cst_31 : f32 to vector<8x8xf32>
    %70 = arith.mulf %68, %69 : vector<8x8xf32>
    %cst_32 = arith.constant -1.000000e+30 : f32
    %71 = vector.broadcast %cst_32 : f32 to vector<8x8xf32>
    %72 = arith.select %15, %70, %71 : vector<8x8xi1>, vector<8x8xf32>
    %cst_33 = arith.constant dense<0xFF800000> : vector<8xf32>
    %73 = vector.multi_reduction <maximumf>, %72, %cst_33 [1] : vector<8x8xf32> to vector<8xf32>
    %74 = vector.shape_cast %73 : vector<8xf32> to vector<8x1xf32>
    %75 = vector.broadcast %74 : vector<8x1xf32> to vector<8x8xf32>
    %76 = arith.subf %72, %75 : vector<8x8xf32>
    %77 = math.exp %76 : vector<8x8xf32>
    %cst_34 = arith.constant dense<0.000000e+00> : vector<8xf32>
    %78 = vector.multi_reduction <add>, %77, %cst_34 [1] : vector<8x8xf32> to vector<8xf32>
    %79 = vector.shape_cast %78 : vector<8xf32> to vector<8x1xf32>
    %80 = tpu.reciprocal %79 {approx = true} : vector<8x1xf32> -> vector<8x1xf32>
    %81 = vector.broadcast %80 : vector<8x1xf32> to vector<8x8xf32>
    %82 = arith.mulf %77, %81 : vector<8x8xf32>
    %cst_35 = arith.constant dense<0.000000e+00> : vector<8x8xf32>
    %83 = tpu.matmul %82, %67, %cst_35 {dimension_numbers = #tpu.dot_dimension_numbers<[1], [0], [0], [1], [0, 0, 1, 1], [], []>} : vector<8x8xf32>, vector<8x8xf32>, vector<8x8xf32> -> vector<8x8xf32>
    %c2 = arith.constant 2 : index
    %c0_36 = arith.constant 0 : index
    %c0_37 = arith.constant 0 : index
    %84 = vector.load %arg5[%c2, %c0_36, %c0_37] : memref<4x8x32xf32, #tpu.memory_space<vmem>>, vector<1x8x32xf32>
    %85 = vector.shape_cast %84 : vector<1x8x32xf32> to vector<8x32xf32>
    %cst_38 = arith.constant dense<0.000000e+00> : vector<8x32xf32>
    %86 = tpu.matmul %83, %85, %cst_38 {dimension_numbers = #tpu.dot_dimension_numbers<[1], [0], [0], [1], [0, 0, 1, 1], [], []>} : vector<8x8xf32>, vector<8x32xf32>, vector<8x32xf32> -> vector<8x32xf32>
    %87 = arith.addf %64, %86 : vector<8x32xf32>
    %88 = vector.extract_strided_slice %8 {offsets = [0, 24], sizes = [8, 8], strides = [1, 1]} : vector<8x32xf32> to vector<8x8xf32>
    %89 = vector.extract_strided_slice %10 {offsets = [0, 24], sizes = [8, 8], strides = [1, 1]} : vector<8x64xf32> to vector<8x8xf32>
    %90 = vector.extract_strided_slice %10 {offsets = [0, 56], sizes = [8, 8], strides = [1, 1]} : vector<8x64xf32> to vector<8x8xf32>
    %cst_39 = arith.constant dense<0.000000e+00> : vector<8x8xf32>
    %91 = tpu.matmul %88, %89, %cst_39 {dimension_numbers = #tpu.dot_dimension_numbers<[1], [1], [0], [0], [0, 0, 1, 0], [], []>} : vector<8x8xf32>, vector<8x8xf32>, vector<8x8xf32> -> vector<8x8xf32>
    %cst_40 = arith.constant 0.353553385 : f32
    %92 = vector.broadcast %cst_40 : f32 to vector<8x8xf32>
    %93 = arith.mulf %91, %92 : vector<8x8xf32>
    %cst_41 = arith.constant -1.000000e+30 : f32
    %94 = vector.broadcast %cst_41 : f32 to vector<8x8xf32>
    %95 = arith.select %15, %93, %94 : vector<8x8xi1>, vector<8x8xf32>
    %cst_42 = arith.constant dense<0xFF800000> : vector<8xf32>
    %96 = vector.multi_reduction <maximumf>, %95, %cst_42 [1] : vector<8x8xf32> to vector<8xf32>
    %97 = vector.shape_cast %96 : vector<8xf32> to vector<8x1xf32>
    %98 = vector.broadcast %97 : vector<8x1xf32> to vector<8x8xf32>
    %99 = arith.subf %95, %98 : vector<8x8xf32>
    %100 = math.exp %99 : vector<8x8xf32>
    %cst_43 = arith.constant dense<0.000000e+00> : vector<8xf32>
    %101 = vector.multi_reduction <add>, %100, %cst_43 [1] : vector<8x8xf32> to vector<8xf32>
    %102 = vector.shape_cast %101 : vector<8xf32> to vector<8x1xf32>
    %103 = tpu.reciprocal %102 {approx = true} : vector<8x1xf32> -> vector<8x1xf32>
    %104 = vector.broadcast %103 : vector<8x1xf32> to vector<8x8xf32>
    %105 = arith.mulf %100, %104 : vector<8x8xf32>
    %cst_44 = arith.constant dense<0.000000e+00> : vector<8x8xf32>
    %106 = tpu.matmul %105, %90, %cst_44 {dimension_numbers = #tpu.dot_dimension_numbers<[1], [0], [0], [1], [0, 0, 1, 1], [], []>} : vector<8x8xf32>, vector<8x8xf32>, vector<8x8xf32> -> vector<8x8xf32>
    %c3 = arith.constant 3 : index
    %c0_45 = arith.constant 0 : index
    %c0_46 = arith.constant 0 : index
    %107 = vector.load %arg5[%c3, %c0_45, %c0_46] : memref<4x8x32xf32, #tpu.memory_space<vmem>>, vector<1x8x32xf32>
    %108 = vector.shape_cast %107 : vector<1x8x32xf32> to vector<8x32xf32>
    %cst_47 = arith.constant dense<0.000000e+00> : vector<8x32xf32>
    %109 = tpu.matmul %106, %108, %cst_47 {dimension_numbers = #tpu.dot_dimension_numbers<[1], [0], [0], [1], [0, 0, 1, 1], [], []>} : vector<8x8xf32>, vector<8x32xf32>, vector<8x32xf32> -> vector<8x32xf32>
    %110 = arith.addf %87, %109 : vector<8x32xf32>
    %c0_48 = arith.constant 0 : index
    %c0_49 = arith.constant 0 : index
    %c0_50 = arith.constant 0 : index
    %111 = vector.load %arg7[%c0_48, %c0_49, %c0_50] : memref<1x8x32xf32, #tpu.memory_space<vmem>>, vector<1x8x32xf32>
    %112 = vector.shape_cast %111 : vector<1x8x32xf32> to vector<8x32xf32>
    %113 = vector.shape_cast %110 : vector<8x32xf32> to vector<1x8x32xf32>
    tpu.vector_store %arg7[%c0_48, %c0_49, %c0_50], %113 {strides = array<i32>} : memref<1x8x32xf32, #tpu.memory_space<vmem>>, vector<1x8x32xf32>,
    return
  }
  func.func @transform_0(%arg0: i32, %arg1: i32) -> (i32, i32, i32) {
    %c0_i32 = arith.constant 0 : i32
    %c0_i32_0 = arith.constant 0 : i32
    %c0_i32_1 = arith.constant 0 : i32
    return %arg0, %c0_i32, %c0_i32_0 : i32, i32, i32
  }
  func.func @transform_1(%arg0: i32, %arg1: i32) -> (i32, i32) {
    %c0_i32 = arith.constant 0 : i32
    %c0_i32_0 = arith.constant 0 : i32
    %c0_i32_1 = arith.constant 0 : i32
    return %c0_i32, %c0_i32_0 : i32, i32
  }
  func.func @transform_2(%arg0: i32, %arg1: i32) -> (i32, i32) {
    %c0_i32 = arith.constant 0 : i32
    %c0_i32_0 = arith.constant 0 : i32
    %c0_i32_1 = arith.constant 0 : i32
    return %c0_i32, %c0_i32_0 : i32, i32
  }
  func.func @transform_3(%arg0: i32, %arg1: i32) -> (i32, i32, i32) {
    %c0_i32 = arith.constant 0 : i32
    %c0_i32_0 = arith.constant 0 : i32
    %c0_i32_1 = arith.constant 0 : i32
    %c0_i32_2 = arith.constant 0 : i32
    return %c0_i32, %c0_i32_0, %c0_i32_1 : i32, i32, i32
  }
  func.func @transform_4(%arg0: i32, %arg1: i32) -> (i32, i32) {
    %c0_i32 = arith.constant 0 : i32
    %c0_i32_0 = arith.constant 0 : i32
    %c0_i32_1 = arith.constant 0 : i32
    return %c0_i32, %c0_i32_0 : i32, i32
  }
  func.func @transform_5(%arg0: i32, %arg1: i32) -> (i32, i32, i32) {
    %c0_i32 = arith.constant 0 : i32
    %c0_i32_0 = arith.constant 0 : i32
    return %arg0, %arg1, %c0_i32 : i32, i32, i32
  }
}

</mosaic_0001>

<bundles_post_ra>
// kernel: tpu_custom_call.1
= control target key start
LH: loop header
LB: loop body
LE: loop exit
PB: predicated region body
PF: predicated region fallthrough
CT: control target
= control target key end

     0   :  { %10 = vsyncpa [#allocation3], 0  ;;  %s2509_s0 = inlined_call_operand.hbm [shape: f32[2,8,32], index: 0, kind: input, shape index: {}]   ;;  %s2510_s1 = inlined_call_operand.hbm [shape: f32[32,32], index: 1, kind: input, shape index: {}]   ;;  %s2511_s2 = inlined_call_operand.hbm [shape: f32[32,64], index: 2, kind: input, shape index: {}]   ;;  %s2512_s3 = inlined_call_operand.hbm [shape: f32[4,8,32], index: 3, kind: input, shape index: {}]   ;;  %s2513_s4 = inlined_call_operand.vmem [shape: f32[1,32], index: 4, kind: input, shape index: {}]   ;;  %s2514_s5 = inlined_call_operand.hbm [shape: f32[2,8,32], index: 5, kind: output, shape index: {}]  }
   0x1   :  { %12 = vsyncpa [#allocation3 + $0x1], 0 }
   0x2   :  { %13 = vsyncpa [#allocation6], 0 }
   0x3   :  { %14 = vsyncpa [#allocation9], 0 }
   0x4   :  { %15 = vsyncpa [#allocation4], 0 }
   0x5   :  { %17 = vsyncpa [#allocation4 + $0x1], 0  ;;  %s2114_s18 = smov 0   ;;  %s2116_s19 = smov 0  }
   0x6   :  { %s2118_s20 = smov 0   ;;  %s2120_s21 = smov 0  }
   0x7   :  { %s2122_s22 = smov 0   ;;  %s2124_s23 = smov 0  }
   0x8 LB: > { %2521 = sst [smem:[#allocation15_spill]] %s2045_s18  ;;  %s1567_s24 = sadd.s32 4294967295, %s2065_s23   ;;  %s2065_s23 = sphi %s2124_s23, %s23_s23   ;;  %s2061_s22 = sphi %s2122_s22, %s2544_s22   ;;  %s2057_s21 = sphi %s2120_s21, %s2543_s21   ;;  %s2053_s20 = sphi %s2118_s20, %s2542_s20   ;;  %s2049_s19 = sphi %s2116_s19, %s2541_s19   ;;  %s2045_s18 = sphi %s2114_s18, %s2540_s18  }
   0x9   : > { %s1568_s25 = sadd.s32 4294967294, %s2065_s23   ;;  %p55_p0 = scmp.ne.s32.totalorder %s2049_s19, %s2045_s18 }
   0xa   : > { %p2148_p1 = scmp.eq.s32.totalorder %s1567_s24, 0  ;;  %p2152_p2 = scmp.eq.s32.totalorder %s1567_s24, 1 }
   0xb   : > { %p171_p3 = scmp.eq.s32.totalorder %s1568_s25, 1  ;;  %p1569_p5 = scmp.ge.s32.totalorder %s2065_s23, 1 }
   0xc   : > { %s2522_s26 = scalar_select %p2148_p1, 1, 0 }
   0xd   : > { %s2523_s27 = scalar_select %p2152_p2, 1, 0 }
   0xe   : > { %p2158_p4 = por %p2148_p1, %p55_p0  ;;  %p2163_p6 = por %p171_p3, %p55_p0 }
   0xf   : > { %p178_p7 = scmp.lt.s32.totalorder %s2065_s23, 3  ;;  %s2067_s6 = smov [#allocation5]  }
  0x10   : > { %s2524_s28 = scalar_select %p2158_p4, 1, 0 }
  0x11   : > { %s2525_s29 = scalar_select %p2163_p6, 1, 0 }
  0x12   : > { %p2168_p8 = pnand %p1569_p5, %p178_p7  ;;  %s190_s7 = sshll.u32 %s2067_s6, 4  ;;  %s2172_s7 = int_to_ptr.vmem [resolvable:$true] %s190_s7 }
  0x13   : > { %2526 = sst [smem:[#allocation16_spill]] %s2525_s29  ;;  %s2068_s9 = smov [#allocation7]  }
  0x14   : > { %s2527_s30 = scalar_select %p2168_p8, 1, 0 }
  0x15   : > { %p1756_p9 = pneg %p2168_p8  ;;  %s203_s10 = sshll.u32 %s2068_s9, 4  ;;  %s2183_s10 = int_to_ptr.vmem [resolvable:$true] %s203_s10 }
  0x16   : > { %s2069_s11 = smov [#allocation8]   ;;  %s1861_s15 = scalar_lea.hbm %s2510_s1, 512 }
  0x17   : > { %p2179_p11 = pnand %p1756_p9, %p2148_p1  ;;  %s2185_s12 = sshll.u32 %s2069_s11, 4  ;;  %s217_s12 = int_to_ptr.vmem [resolvable:$true] %s2185_s12 }
  0x18   : > { %p1862_p12 = scmp.ne.s32.totalorder %s2510_s1, %s1861_s15  ;;  %p1868_p5 = scmp.lt.u32.totalorder %s1861_s15, %s2510_s1 }
  0x19   : > { %p2195_p13 = pneg %p2179_p11 }
  0x1b   : > { %p1864_p0 = pnand %p2195_p13, %p1862_p12 }
  0x1d   : > { %p1865_p3 = pneg %p1864_p0 }
  0x1f   : > { %p1870_p7 = pnand %p1868_p5, %p1865_p3 }
  0x21   : > { %1873 = shalt.err (!%p1870_p7)
}
  0x22   : > { %s1874_s9 = scalar_lea.vmem %s2172_s7, 512  ;;  %p1882_p1 = scmp.lt.s32.totalorder %s2172_s7, %s2172_s7 }
  0x23   : > { %p1875_p9 = scmp.ne.s32.totalorder %s2172_s7, %s1874_s9  ;;  %p1883_p4 = scmp.lt.s32.totalorder %s1874_s9, %s1874_s9 }
  0x25   : > { %p1877_p10 = pnand %p1875_p9, %p2195_p13  ;;  %p1884_p12 = por %p1883_p4, %p1882_p1 }
  0x27   : > { %p1878_p6 = pneg %p1877_p10 }
  0x29   : > { %p1885_p0 = pnand %p1884_p12, %p1878_p6 }
  0x2b   : > { %1888 = shalt.err (!%p1885_p0)
}
  0x2c   : > { %s2070_s11 = smov 128   ;;  %s2071_s13 = smov 8  }
  0x2d   : > { %1759 = dma.hbm_to_vmem [thread:$0]  (!%p2179_p11), %s2510_s1, 512, %s2172_s7, [#allocation6], %s2070_s11, %s2070_s11, %s2071_s13  }
  0x2e   : > { %s1889_s25 = scalar_lea.hbm %s2511_s2, 512 }
  0x2f   : > { %p1890_p1 = scmp.ne.s32.totalorder %s2511_s2, %s1889_s25  ;;  %p1896_p10 = scmp.lt.u32.totalorder %s1889_s25, %s2511_s2 }
  0x31   : > { %p1892_p4 = pnand %p1890_p1, %p2195_p13 }
  0x33   : > { %p1893_p6 = pneg %p1892_p4 }
  0x35   : > { %p1898_p3 = pnand %p1896_p10, %p1893_p6 }
  0x37   : > { %1901 = shalt.err (!%p1898_p3)
}
  0x38   : > { %s1902_s7 = scalar_lea.vmem %s2183_s10, 512  ;;  %p1910_p12 = scmp.lt.s32.totalorder %s2183_s10, %s2183_s10 }
  0x39   : > { %p1903_p5 = scmp.ne.s32.totalorder %s2183_s10, %s1902_s7  ;;  %p1911_p0 = scmp.lt.s32.totalorder %s1902_s7, %s1902_s7 }
  0x3b   : > { %p1905_p7 = pnand %p1903_p5, %p2195_p13  ;;  %p1912_p1 = por %p1911_p0, %p1910_p12 }
  0x3d   : > { %p1906_p9 = pneg %p1905_p7 }
  0x3f   : > { %p1913_p4 = pnand %p1912_p1, %p1906_p9 }
  0x41   : > { %1916 = shalt.err (!%p1913_p4)
}
  0x42   : > { %1762 = dma.hbm_to_vmem [thread:$0]  (!%p2179_p11), %s2511_s2, 512, %s2183_s10, [#allocation6], %s2070_s11, %s2070_s11, %s2071_s13  }
  0x43   : > { %s1917_s16 = scalar_lea.hbm %s2512_s3, 512 }
  0x44   : > { %p1918_p6 = scmp.ne.s32.totalorder %s2512_s3, %s1917_s16  ;;  %p1924_p5 = scmp.lt.u32.totalorder %s1917_s16, %s2512_s3 }
  0x46   : > { %p1920_p10 = pnand %p1918_p6, %p2195_p13 }
  0x48   : > { %p1921_p3 = pneg %p1920_p10 }
  0x4a   : > { %p1926_p7 = pnand %p1924_p5, %p1921_p3 }
  0x4c   : > { %1929 = shalt.err (!%p1926_p7)
}
  0x4d   : > { %s1930_s7 = scalar_lea.vmem %s217_s12, 512  ;;  %p1938_p1 = scmp.lt.s32.totalorder %s217_s12, %s217_s12 }
  0x4e   : > { %p1931_p9 = scmp.ne.s32.totalorder %s217_s12, %s1930_s7  ;;  %p1939_p4 = scmp.lt.s32.totalorder %s1930_s7, %s1930_s7 }
  0x50   : > { %p1933_p12 = pnand %p1931_p9, %p2195_p13  ;;  %p1940_p8 = por %p1939_p4, %p1938_p1 }
  0x52   : > { %p1934_p0 = pneg %p1933_p12 }
  0x54   : > { %p1941_p2 = pnand %p1940_p8, %p1934_p0 }
  0x56   : > { %1944 = shalt.err (!%p1941_p2)
}
  0x57   : > { %1765 = dma.hbm_to_vmem [thread:$0]  (!%p2179_p11), %s2512_s3, 512, %s217_s12, [#allocation9], %s2070_s11, %s2070_s11, %s2071_s13  }
  0x58   : > { %s42_s24 = sadd.s32 1, %s2053_s20  ;;  %s35_s8 = sadd.s32 1, %s2061_s22 }
  0x59   : > { %p49_p2 = scmp.ne.s32.totalorder %s2053_s20, %s2049_s19  ;;  %p37_p8 = scmp.ge.s32.totalorder %s35_s8, 2 }
  0x5a   : > { %p50_p13 = scmp.eq.s32.totalorder %s2065_s23, 0  ;;  %p2530_p6 = scmp.ne.s32.totalorder %s2523_s27, 0 }
  0x5b   : > { %p1777_p3 = scmp.lt.s32.totalorder %s2065_s23, 2  ;;  %s2546_s8 = smov (%p37_p8, %s35_s8), 0 }
  0x5c   : > { %p2274_p10 = por %p2530_p6, %p49_p2  ;;  %p51_p5 = por %p50_p13, %p49_p2 }
  0x5d   : > { %s233_s14 = sand.u32 1, %s2053_s20   ;;  %s39_s15 = ssub.s32 %s2061_s22, %s2546_s8 }
  0x5e   : > { %p40_p7 = scmp.eq.s32.totalorder %s39_s15, 0  ;;  %s1574_s12 = sshll.u32 %s233_s14, 3 }
  0x5f   : > { %s1575_s11 = sshll.u32 %s2061_s22, 7  ;;  %s237_s25 = scalar_lea.vmem [#allocation2], %s1574_s12 }
  0x60   : > { %s2286_s13 = scalar_select %p40_p7, %s2053_s20, %s42_s24  }
  0x61   : > { %s2291_s27 = scalar_lea.hbm %s2509_s0, %s1575_s11  ;;  %s244_s6 = sshll.u32 %s237_s25, 4  ;;  %s2293_s6 = int_to_ptr.vmem [resolvable:$true] %s244_s6 }
  0x62   : > { %p2297_p11 = pnand %p1777_p3, %p51_p5  ;;  %s234_s7 = scalar_lea.sflag [#allocation3], %s233_s14 }
  0x63   : > { %s1945_s10 = scalar_lea.hbm %s2291_s27, 128  ;;  %s1950_s15 = scalar_lea.hbm %s2509_s0, 256 }
  0x64   : > { %p1946_p9 = scmp.ne.s32.totalorder %s2291_s27, %s1945_s10  ;;  %p1947_p12 = pneg %p2297_p11 }
  0x65   : > { %p1951_p4 = scmp.lt.u32.totalorder %s2291_s27, %s2509_s0  ;;  %p1952_p2 = scmp.lt.u32.totalorder %s1950_s15, %s1945_s10 }
  0x66   : > { %p1948_p0 = pnand %p1947_p12, %p1946_p9  ;;  %p1954_p13 = scmp.lt.u32.totalorder %s1945_s10, %s2291_s27 }
  0x67   : > { %p1953_p8 = por %p1952_p2, %p1951_p4 }
  0x68   : > { %p1949_p1 = pneg %p1948_p0 }
  0x69   : > { %p1955_p6 = por %p1954_p13, %p1953_p8 }
  0x6b   : > { %p1956_p3 = pnand %p1955_p6, %p1949_p1 }
  0x6d   : > { %1959 = shalt.err (!%p1956_p3)
}
  0x6e   : > { %s1960_s14 = scalar_lea.vmem %s2293_s6, 128  ;;  %s2072_s16 = smov [#allocation2]  }
  0x6f   : > { %p1961_p5 = scmp.ne.s32.totalorder %s2293_s6, %s1960_s14  ;;  %s1965_s17 = sshll.u32 %s2072_s16, 4  ;;  %s1966_s17 = int_to_ptr.vmem [resolvable:$false] %s1965_s17 }
  0x70   : > { %s1967_s25 = scalar_lea.vmem %s1966_s17, 256  ;;  %p1968_p0 = scmp.lt.s32.totalorder %s2293_s6, %s1966_s17 }
  0x71   : > { %p1963_p7 = pnand %p1961_p5, %p1947_p12  ;;  %p1969_p4 = scmp.lt.s32.totalorder %s1967_s25, %s1960_s14 }
  0x73   : > { %p1964_p9 = pneg %p1963_p7  ;;  %p1970_p2 = por %p1969_p4, %p1968_p0 }
  0x75   : > { %p1971_p8 = pnand %p1970_p2, %p1964_p9 }
  0x77   : > { %1974 = shalt.err (!%p1971_p8)
}
  0x78   : > { %1769 = dma.hbm_to_vmem [thread:$0]  (!%p2297_p11), %s2291_s27, 128, %s2293_s6, %s234_s7  }
  0x79   : > { %p2533_p1 = scmp.ne.s32.totalorder %s2527_s30, 0 }
  0x7a   : > { %s2329_s10 = sand.u32 (!%p2533_p1), 1, %s2049_s19   ;;  %p2534_p12 = scmp.ne.s32.totalorder (!%p2533_p1), %s2524_s28, 0 }
  0x7b   : > { %253 = sbr.rel (%p2533_p1) target bundleno = 2401 (0x961), region = 40  ;;  %s1577_s18 = sshll.u32 (!%p2533_p1), %s2329_s10, 3 }
  0x7c   : > { %s256_s24 = scalar_lea.sflag (!%p2533_p1), [#allocation3], %s2329_s10  ;;  %s2335_s15 = scalar_lea.vmem (!%p2533_p1), [#allocation2], %s1577_s18 }
  0x82   : > { %2028 = dma.done.wait (%p2534_p12), %s256_s24, 128  }
  0x83   : > { %2030 = vsyncadd (%p2534_p12), %s256_s24, 4294967168  ;;  %p2535_p11 = scmp.ne.s32.totalorder %s2522_s26, 0 }
  0x85   : > { %2032 = dma.done.wait (%p2535_p11), [#allocation6], 1024  }
  0x86   : > { %2034 = vsyncadd (%p2535_p11), [#allocation6], 4294966272 }
  0x87   : > { %2036 = dma.done.wait (%p2535_p11), [#allocation9], 512  }
  0x88   : > { %2038 = vsyncadd (%p2535_p11), [#allocation9], 4294966784  ;;  %v2073_v0 = vmov 0.0|0.0   ;;  %vm2074_vm0 = vmmov 0   ;;  %v2075_v1 = vmov 0.0   ;;  %v380_v2 = vld [vmem:[#allocation7] sm:$0xff]  ;;  %v457_v20 = vlaneseq }
  0x89   : > { %1727 = vmatprep.subr.bf16.mxu1 %v2073_v0  ;;  %1721 = vmatprep.subr.bf16.mxu0 %v2073_v0  ;;  %v381_v3 = vld [vmem:[#allocation7 + $0x8] sm:$0xff]  ;;  %v302_v4 = vld [vmem:[#allocation5] sm:$0xff]  ;;  %v382_v7 = vld [vmem:[#allocation7 + $0x10] sm:$0xff]  ;;  %vm306_vm1 = vcmask 261120   ;;  %vm471_vm2 = vcmask 64512   ;;  %s2076_s26 = smov 96  }
  0x8a   : > { %1658 = vmatprep.mubr.msk.f32.mxu1 %vm2074_vm0, %v2075_v1  ;;  %1647 = vmatprep.mubr.msk.f32.mxu0 %vm2074_vm0, %v2075_v1  ;;  %v1728_v5 = vpack.c.bf16 %v381_v3, %v380_v2  ;;  %v303_v6 = vld [vmem:[#allocation5 + $0x8] sm:$0xff]  ;;  %v383_v8 = vld [vmem:[#allocation7 + $0x18] sm:$0xff]  ;;  %v304_v10 = vld [vmem:[#allocation5 + $0x10] sm:$0xff]  ;;  %s2077_s28 = smov 120   ;;  %s2078_s30 = smov 112   ;;  %v2378_v21 = vshrl.u32 %v457_v20, 7 }
  0x8b   : > { %v1722_v9 = vpack.c.bf16 %v303_v6, %v302_v4  ;;  %v305_v11 = vld [vmem:[#allocation5 + $0x18] sm:$0xff]  ;;  %v1731_v12 = vpack.c.bf16 %v383_v8, %v382_v7  ;;  %v2380_v22 = vand.u32 127, %v457_v20  ;;  %v637_v40 = vld [vmem:[#allocation8] sm:$0xff]  ;;  %s2079_s27 = smov 80   ;;  %s2080_s6 = smov 104  }
  0x8c   : > { %1729 = vmatpush3.bf16.msra.mxu1 %v1728_v5  ;;  %v1725_v13 = vpack.c.bf16 %v305_v11, %v304_v10  ;;  %v298_v14 = vld [vmem:[%s2335_s15] sm:$0xff]  ;;  %s2081_s9 = smov 88   ;;  %v880_v10 = vld [vmem:[#allocation8 + $0x8] sm:$0xff]  ;;  %s2082_s7 = smov 72  }
  0x8d   : > { %1723 = vmatpush3.bf16.msra.mxu0 %v1722_v9  ;;  %1730 = vmatprep.subr.bf16.mxu1 %v2073_v0  ;;  %vm463_vm3 = vcmp.le.s32.totalorder %v2380_v22, %v2378_v21  ;;  %s1602_s14 = sshll.u32 %s2057_s21, 7  ;;  %s297_s16 = scalar_lea.vmem [#allocation10], %s1577_s18 }
  0x8e   : > { %1724 = vmatprep.subr.bf16.mxu0 %v2073_v0  ;;  %s1457_s17 = sshll.u32 %s297_s16, 4  ;;  %s2459_s15 = scalar_lea.hbm %s2514_s5, %s1602_s14  ;;  %s2461_s17 = int_to_ptr.vmem [resolvable:$true] %s1457_s17 }
  0x8f   : > { %s1975_s21 = scalar_lea.vmem %s2461_s17, 128  ;;  %s2083_s18 = smov [#allocation10]  }
  0x90   : > { %1732 = vmatpush3.bf16.msra.mxu1 %v1731_v12  ;;  %p1976_p13 = scmp.ne.s32.totalorder %s2461_s17, %s1975_s21 }
  0x91   : > { %1726 = vmatpush3.bf16.msra.mxu0 %v1725_v13  ;;  %1661 = vmatprep.subr.mxu1 %v2075_v1 }
  0x92   : > { %1671 = vmatprep.subr.mxu0 %v2075_v1  ;;  %p1977_p6 = pnand %p1976_p13, %p2274_p10 }
  0x93   : > { %1659 = vmatmul.mubr.msk.f32.vlgmr.msra.gmra.mrb[0].mxu1 %vm306_vm1, %v298_v14 }
  0x94   : > { %1648 = vmatmul.mubr.msk.f32.vlgmr.msra.gmra.mrb[0].mxu0 %vm306_vm1, %v298_v14  ;;  %1663 = vmatprep.mubr.msk.f32.mxu1 %vm2074_vm0, %v2075_v1  ;;  %p1978_p3 = pneg %p1977_p6 }
  0x95   : > { %1673 = vmatprep.mubr.msk.f32.mxu0 %vm2074_vm0, %v2075_v1  ;;  %1672 = vmatpush3.msra.mxu0 %v637_v40 }
  0x96   : > { %1681 = vmatprep.subr.mxu0 %v2075_v1 }
 0x166   : > { %v2362_v15 = vpop.f32.mrb[0].mxu1 }
 0x167   : > { %561 = vrot.lane.b32.xlu1 %v2362_v15, %s2076_s26  ;;  %v1660_v16 = vpop.f32.mrb[1].mxu1  ;;  %1662 = vmatpush3.xpose.msk.msra.mxu1 %vm471_vm2, %v2362_v15  ;;  %v2367_v17 = vpop.f32.mrb[0].mxu0  ;;  %s1443_s26 = scalar_lea.sflag [#allocation4], %s2329_s10 }
 0x168   : > { %v1649_v18 = vpop.f32.mrb[1].mxu0  ;;  %1666 = vmatprep.subr.mxu1 %v2075_v1 }
 0x16a   : > { %1664 = vmatmul.mubr.msk.f32.vlgmr.msra.gmra.mrb[2].mxu1 %vm471_vm2, %v2367_v17 }
 0x16b   : > { %714 = vrot.lane.b32.xlu1 %v2362_v15, %s2077_s28  ;;  %1668 = vmatprep.mubr.msk.f32.mxu1 %vm2074_vm0, %v2075_v1 }
 0x16f   : > { %957 = vrot.lane.b32.xlu1 %v2362_v15, %s2078_s30 }
 0x173   : > { %955 = vrot.lane.b32.xlu1 %v2367_v17, %s2078_s30 }
 0x1d9   : > { %v562_v19 = vpop.permute.xlu1 %561 }
 0x1da   : > { %1667 = vmatpush3.msra.mxu1 %v562_v19  ;;  %v1123_v19 = vld [vmem:[#allocation8 + $0x10] sm:$0xff] }
 0x1db   : > { %1676 = vmatprep.subr.mxu1 %v2075_v1 }
 0x1dd   : > { %v715_v34 = vpop.permute.xlu1 %714 }
 0x1e1   : > { %v958_v37 = vpop.permute.xlu1 %957 }
 0x1e5   : > { %v956_v39 = vpop.permute.xlu1 %955 }
 0x23d   : > { %v544_v23 = vpop.f32.mrb[2].mxu1 }
 0x23e   : > { %v548_v24 = vmul.f32 0.35355338, %v544_v23  ;;  %v1665_v25 = vpop.f32.mrb[3].mxu1 }
 0x240   : > { %v549_v26 = vsel %vm463_vm3, %v548_v24, -1e+30 }
 0x241   : > { %v550_v27 = vsel %vm471_vm2, %v549_v26, -inf }
 0x242   : > { %551 = vmax.xlane.f32.xlu0 %v550_v27 }
 0x2cf   : > { %v552_v28 = vpop.xlane.xlu0 %551 }
 0x2d0   : > { %v553_v29 = vsub.f32 %v549_v26, %v552_v28 }
 0x2d2   : > { %v554_v30 = vmul.f32 1.442695, %v553_v29 }
 0x2d4   : > { %1845 = vpow2.f32 %v554_v30 }
 0x2de   : > { %v1846_v31 = vpop.eup %1845 }
 0x2df   : > { %v556_v32 = vsel %vm471_vm2, %v1846_v31, 0.0 }
 0x2e0   : > { %557 = vadd.xlane.f32.xlu0 %v556_v32 }
 0x2f6   : > { %712 = vrot.lane.b32.xlu0 %v2367_v17, %s2077_s28  ;;  %s1979_s28 = sshll.u32 %s2083_s18, 4  ;;  %s1980_s28 = int_to_ptr.vmem [resolvable:$false] %s1979_s28 }
 0x2f7   : > { %s1981_s30 = scalar_lea.vmem %s1980_s28, 256  ;;  %p1982_p5 = scmp.lt.s32.totalorder %s2461_s17, %s1980_s28 }
 0x2f8   : > { %p1983_p7 = scmp.lt.s32.totalorder %s1981_s30, %s1975_s21 }
 0x2fa   : > { %p1984_p9 = por %p1983_p7, %p1982_p5 }
 0x2fc   : > { %p1985_p0 = pnand %p1984_p9, %p1978_p3 }
 0x36d   : > { %v558_v33 = vpop.xlane.xlu0 %557 }
 0x36e   : > { %1847 = vrcp.f32 %v558_v33  ;;  %v1584_v33 = vld [vmem:[%s2513_s4] ss:$0 sm:$0xff] }
 0x371   : > { %v713_v38 = vpop.permute.xlu0 %712 }
 0x378   : > { %v1848_v35 = vpop.eup %1847 }
 0x379   : > { %v560_v36 = vmul.f32 %v1848_v35, %v1846_v31  ;;  %v1366_v31 = vld [vmem:[#allocation8 + $0x18] sm:$0xff] }
 0x37b   : > { %1669 = vmatmul.mubr.msk.f32.vlgmr.msra.gmra.mrb[4].mxu1 %vm471_vm2, %v560_v36 }
 0x37c   : > { %1677 = vmatpush3.xpose.msk.msra.mxu1 %vm471_vm2, %v715_v34  ;;  %1678 = vmatprep.mubr.msk.f32.mxu1 %vm2074_vm0, %v2075_v1 }
 0x37d   : > { %1691 = vmatprep.subr.mxu1 %v2075_v1 }
 0x37f   : > { %1679 = vmatmul.mubr.msk.f32.vlgmr.msra.gmra.mrb[6].mxu1 %vm471_vm2, %v713_v38 }
 0x380   : > { %1692 = vmatpush3.xpose.msk.msra.mxu1 %vm471_vm2, %v958_v37  ;;  %1693 = vmatprep.mubr.msk.f32.mxu1 %vm2074_vm0, %v2075_v1 }
 0x381   : > { %1696 = vmatprep.subr.mxu1 %v2075_v1 }
 0x383   : > { %1694 = vmatmul.mubr.msk.f32.vlgmr.msra.gmra.mrb[8].mxu1 %vm471_vm2, %v956_v39 }
 0x384   : > { %1698 = vmatprep.mubr.msk.f32.mxu1 %vm2074_vm0, %v2075_v1 }
 0x44e   : > { %v633_v41 = vpop.f32.mrb[4].mxu1 }
 0x44f   : > { %v1670_v42 = vpop.f32.mrb[5].mxu1  ;;  %1674 = vmatmul.mubr.msk.f32.vlgmr.msra.gmra.mrb[2].mxu0 %vm471_vm2, %v633_v41 }
 0x450   : > { %1683 = vmatprep.mubr.msk.f32.mxu0 %vm2074_vm0, %v2075_v1 }
 0x452   : > { %v786_v43 = vpop.f32.mrb[6].mxu1 }
 0x453   : > { %v1680_v44 = vpop.f32.mrb[7].mxu1  ;;  %v790_v50 = vmul.f32 0.35355338, %v786_v43 }
 0x455   : > { %v791_v51 = vsel %vm463_vm3, %v790_v50, -1e+30 }
 0x456   : > { %v1029_v45 = vpop.f32.mrb[8].mxu1  ;;  %v792_v52 = vsel %vm471_vm2, %v791_v51, -inf }
 0x457   : > { %v1033_v46 = vmul.f32 0.35355338, %v1029_v45  ;;  %v1695_v47 = vpop.f32.mrb[9].mxu1 }
 0x459   : > { %v1034_v48 = vsel %vm463_vm3, %v1033_v46, -1e+30 }
 0x45a   : > { %v1035_v49 = vsel %vm471_vm2, %v1034_v48, -inf }
 0x45b   : > { %1036 = vmax.xlane.f32.xlu1 %v1035_v49 }
 0x46c   : > { %1046 = vrot.lane.b32.xlu1 %v2362_v15, %s2079_s27 }
 0x470   : > { %1198 = vrot.lane.b32.xlu1 %v2367_v17, %s2080_s6 }
 0x494   : > { %793 = vmax.xlane.f32.xlu1 %v792_v52 }
 0x4a5   : > { %803 = vrot.lane.b32.xlu1 %v2362_v15, %s2081_s9 }
 0x4e8   : > { %v1037_v53 = vpop.xlane.xlu1 %1036 }
 0x4e9   : > { %v1038_v54 = vsub.f32 %v1034_v48, %v1037_v53 }
 0x4eb   : > { %v1039_v55 = vmul.f32 1.442695, %v1038_v54 }
 0x4ec   : > { %v1047_v56 = vpop.permute.xlu1 %1046 }
 0x4ed   : > { %1849 = vpow2.f32 %v1039_v55  ;;  %1697 = vmatpush3.msra.mxu1 %v1047_v56 }
 0x4ee   : > { %1706 = vmatprep.subr.mxu1 %v2075_v1 }
 0x4f0   : > { %v1199_v59 = vpop.permute.xlu1 %1198 }
 0x4f7   : > { %v1850_v57 = vpop.eup %1849 }
 0x4f8   : > { %v1041_v58 = vsel %vm471_vm2, %v1850_v57, 0.0 }
 0x4f9   : > { %1042 = vadd.xlane.f32.xlu0 %v1041_v58 }
 0x50f   : > { %1200 = vrot.lane.b32.xlu0 %v2362_v15, %s2080_s6 }
 0x521   : > { %v794_v60 = vpop.xlane.xlu1 %793 }
 0x522   : > { %v795_v61 = vsub.f32 %v791_v51, %v794_v60 }
 0x524   : > { %v796_v62 = vmul.f32 1.442695, %v795_v61 }
 0x525   : > { %v804_v63 = vpop.permute.xlu1 %803 }
 0x526   : > { %1851 = vpow2.f32 %v796_v62  ;;  %1682 = vmatpush3.msra.mxu0 %v804_v63 }
 0x527   : > { %1686 = vmatprep.subr.mxu0 %v2075_v1 }
 0x530   : > { %v1852_v0 = vpop.eup %1851 }
 0x531   : > { %v798_v2 = vsel %vm471_vm2, %v1852_v0, 0.0 }
 0x532   : > { %799 = vadd.xlane.f32.xlu0 %v798_v2 }
 0x586   : > { %v1043_v3 = vpop.xlane.xlu0 %1042 }
 0x587   : > { %1853 = vrcp.f32 %v1043_v3 }
 0x58a   : > { %v1201_v6 = vpop.permute.xlu0 %1200 }
 0x591   : > { %v1854_v4 = vpop.eup %1853 }
 0x592   : > { %v1045_v5 = vmul.f32 %v1854_v4, %v1850_v57 }
 0x594   : > { %1699 = vmatmul.mubr.msk.f32.vlgmr.msra.gmra.mrb[10].mxu1 %vm471_vm2, %v1045_v5 }
 0x595   : > { %1707 = vmatpush3.xpose.msk.msra.mxu1 %vm471_vm2, %v1201_v6  ;;  %1708 = vmatprep.mubr.msk.f32.mxu1 %vm2074_vm0, %v2075_v1 }
 0x598   : > { %1709 = vmatmul.mubr.msk.f32.vlgmr.msra.gmra.mrb[12].mxu1 %vm471_vm2, %v1199_v59 }
 0x5bf   : > { %v800_v7 = vpop.xlane.xlu0 %799 }
 0x5c0   : > { %1855 = vrcp.f32 %v800_v7 }
 0x5ca   : > { %v1856_v8 = vpop.eup %1855 }
 0x5cb   : > { %v802_v9 = vmul.f32 %v1856_v8, %v1852_v0 }
 0x5cd   : > { %1684 = vmatmul.mubr.msk.f32.vlgmr.msra.gmra.mrb[4].mxu0 %vm471_vm2, %v802_v9 }
 0x5ce   : > { %1688 = vmatprep.mubr.msk.f32.mxu0 %vm2074_vm0, %v2075_v1  ;;  %1687 = vmatpush3.msra.mxu0 %v880_v10 }
 0x5cf   : > { %1701 = vmatprep.subr.mxu0 %v2075_v1 }
 0x667   : > { %v1118_v11 = vpop.f32.mrb[10].mxu1 }
 0x668   : > { %v1700_v12 = vpop.f32.mrb[11].mxu1 }
 0x66b   : > { %v1272_v13 = vpop.f32.mrb[12].mxu1 }
 0x66c   : > { %v1276_v14 = vmul.f32 0.35355338, %v1272_v13  ;;  %v1710_v16 = vpop.f32.mrb[13].mxu1 }
 0x66e   : > { %v1277_v17 = vsel %vm463_vm3, %v1276_v14, -1e+30 }
 0x66f   : > { %v1278_v18 = vsel %vm471_vm2, %v1277_v17, -inf }
 0x670   : > { %1279 = vmax.xlane.f32.xlu0 %v1278_v18 }
 0x6a0   : > { %v875_v20 = vpop.f32.mrb[4].mxu0 }
 0x6a1   : > { %v1685_v23 = vpop.f32.mrb[5].mxu0  ;;  %1689 = vmatmul.mubr.msk.f32.vlgmr.msra.gmra.mrb[2].mxu0 %vm471_vm2, %v875_v20 }
 0x6a2   : > { %1702 = vmatpush3.msra.mxu0 %v1123_v19  ;;  %1703 = vmatprep.mubr.msk.f32.mxu0 %vm2074_vm0, %v2075_v1 }
 0x6a3   : > { %1711 = vmatprep.subr.mxu0 %v2075_v1 }
 0x6a9   : > { %1704 = vmatmul.mubr.msk.f32.vlgmr.msra.gmra.mrb[2].mxu0 %vm471_vm2, %v1118_v11 }
 0x6aa   : > { %1713 = vmatprep.mubr.msk.f32.mxu0 %vm2074_vm0, %v2075_v1 }
 0x6fd   : > { %v1280_v21 = vpop.xlane.xlu0 %1279 }
 0x6fe   : > { %v1281_v22 = vsub.f32 %v1277_v17, %v1280_v21 }
 0x700   : > { %v1282_v24 = vmul.f32 1.442695, %v1281_v22 }
 0x702   : > { %1857 = vpow2.f32 %v1282_v24 }
 0x70c   : > { %v1858_v25 = vpop.eup %1857 }
 0x70d   : > { %v1284_v26 = vsel %vm471_vm2, %v1858_v25, 0.0 }
 0x70e   : > { %1285 = vadd.xlane.f32.xlu0 %v1284_v26 }
 0x724   : > { %1289 = vrot.lane.b32.xlu0 %v2362_v15, %s2082_s7 }
 0x79b   : > { %v1286_v27 = vpop.xlane.xlu0 %1285 }
 0x79c   : > { %1859 = vrcp.f32 %v1286_v27 }
 0x79f   : > { %v1290_v28 = vpop.permute.xlu0 %1289 }
 0x7a0   : > { %1712 = vmatpush3.msra.mxu0 %v1290_v28 }
 0x7a1   : > { %1716 = vmatprep.subr.mxu0 %v2075_v1 }
 0x7a6   : > { %v1860_v29 = vpop.eup %1859 }
 0x7a7   : > { %v1288_v30 = vmul.f32 %v1860_v29, %v1858_v25 }
 0x7a9   : > { %1714 = vmatmul.mubr.msk.f32.vlgmr.msra.gmra.mrb[6].mxu0 %vm471_vm2, %v1288_v30 }
 0x7aa   : > { %1717 = vmatpush3.msra.mxu0 %v1366_v31  ;;  %1718 = vmatprep.mubr.msk.f32.mxu0 %vm2074_vm0, %v2075_v1 }
 0x87c   : > { %v1361_v32 = vpop.f32.mrb[6].mxu0 }
 0x87d   : > { %v1715_v15 = vpop.f32.mrb[7].mxu0  ;;  %1719 = vmatmul.mubr.msk.f32.vlgmr.msra.gmra.mrb[2].mxu0 %vm471_vm2, %v1361_v32 }
 0x950   : > { %v1436_v34 = vpop.f32.mrb[2].mxu0 }
 0x951   : > { %v1733_v35 = vadd.f32 %v1584_v33, %v1436_v34  ;;  %v1720_v36 = vpop.f32.mrb[3].mxu0 }
 0x953   : > { %1441 = vst.msk [vmem:[%s297_s16] sm:$0xff] %vm306_vm1, %v1733_v35 }
 0x954   : > { %1988 = shalt.err (!%p1985_p0)
}
 0x955   : > { %s1989_s10 = scalar_lea.hbm %s2459_s15, 128  ;;  %s1993_s9 = scalar_lea.hbm %s2514_s5, 256 }
 0x956   : > { %p1990_p4 = scmp.ne.s32.totalorder %s2459_s15, %s1989_s10  ;;  %p1994_p1 = scmp.lt.u32.totalorder %s2459_s15, %s2514_s5 }
 0x957   : > { %p1995_p12 = scmp.lt.u32.totalorder %s1993_s9, %s1989_s10  ;;  %p1997_p13 = scmp.lt.u32.totalorder %s1989_s10, %s2459_s15 }
 0x958   : > { %p1991_p2 = pnand %p1990_p4, %p2274_p10 }
 0x959   : > { %p1996_p11 = por %p1995_p12, %p1994_p1 }
 0x95a   : > { %p1992_p8 = pneg %p1991_p2 }
 0x95b   : > { %p1998_p6 = por %p1997_p13, %p1996_p11 }
 0x95d   : > { %p1999_p3 = pnand %p1998_p6, %p1992_p8 }
 0x95f   : > { %2002 = shalt.err (!%p1999_p3)
}
 0x960   : > { %1754 = dma.vmem_to_hbm [thread:$0]  (%p2274_p10), %s2461_s17, 128, %s2459_s15, %s1443_s26  }
 0x961 PF: > { %s2536_s11 = sld [smem:[#allocation15_spill]]  ;;  %s2537_s14 = sld [smem:[#allocation16_spill]] }
 0x962   : > { %p2539_p7 = scmp.ge.s32.totalorder %s2065_s23, 2 }
 0x967   : > { %s1469_s16 = sand.u32 1, %s2536_s11   ;;  %p2538_p5 = scmp.ne.s32.totalorder %s2537_s14, 0 }
 0x968   : > { %s1470_s25 = scalar_lea.sflag [#allocation4], %s1469_s16 }
 0x969   : > { %p1771_p9 = pnand %p2539_p7, %p2538_p5 }
 0x96b   : > { %2040 = dma.done.wait (!%p1771_p9), %s1470_s25, 128  }
 0x96c   : > { %2042 = vsyncadd (!%p1771_p9), %s1470_s25, 4294967168  ;;  %s23_s23 = sadd.s32 1, %s2065_s23   ;;  %s2540_s18 = smov %s2049_s19 }
 0x96d   : > { %p20_p0 = scmp.ge.s32.totalorder %s23_s23, 4   ;;  %s2541_s19 = smov %s2053_s20 }
 0x96e   : > { %s2542_s20 = smov %s2286_s13  ;;  %s2543_s21 = smov %s2061_s22 }
 0x96f   : > { %s2544_s22 = smov %s2546_s8  ;;  %22 = sbr.rel (!%p20_p0) target bundleno = 8 (0x8), region = 101 }
 0x976   :  { %1475 = vsyncpa [#allocation3], 1 }
 0x977   :  { %1477 = vsyncpa [#allocation3 + $0x1], 1 }
 0x978   :  { %1478 = vsyncpa [#allocation6], 1 }
 0x979   :  { %1479 = vsyncpa [#allocation9], 1 }
 0x97a   :  { %1480 = vsyncpa [#allocation4], 1 }
 0x97b   :  { %1482 = vsyncpa [#allocation4 + $0x1], 1 }

// kernel: tpu_custom_call.1
= control target key start
LH: loop header
LB: loop body
LE: loop exit
PB: predicated region body
PF: predicated region fallthrough
CT: control target
= control target key end

     0   :  { %10 = vsyncpa [#allocation3], 0  ;;  %s2509_s0 = inlined_call_operand.hbm [shape: f32[2,8,32], index: 0, kind: input, shape index: {}]   ;;  %s2510_s1 = inlined_call_operand.hbm [shape: f32[32,32], index: 1, kind: input, shape index: {}]   ;;  %s2511_s2 = inlined_call_operand.hbm [shape: f32[32,64], index: 2, kind: input, shape index: {}]   ;;  %s2512_s3 = inlined_call_operand.hbm [shape: f32[4,8,32], index: 3, kind: input, shape index: {}]   ;;  %s2513_s4 = inlined_call_operand.vmem [shape: f32[1,32], index: 4, kind: input, shape index: {}]   ;;  %s2514_s5 = inlined_call_operand.hbm [shape: f32[2,8,32], index: 5, kind: output, shape index: {}]  }
   0x1   :  { %12 = vsyncpa [#allocation3 + $0x1], 0 }
   0x2   :  { %13 = vsyncpa [#allocation6], 0 }
   0x3   :  { %14 = vsyncpa [#allocation9], 0 }
   0x4   :  { %15 = vsyncpa [#allocation4], 0 }
   0x5   :  { %17 = vsyncpa [#allocation4 + $0x1], 0  ;;  %s2114_s18 = smov 0   ;;  %s2116_s19 = smov 0  }
   0x6   :  { %s2118_s20 = smov 0   ;;  %s2120_s21 = smov 0  }
   0x7   :  { %s2122_s22 = smov 0   ;;  %s2124_s23 = smov 0  }
   0x8 LB: > { %2521 = sst [smem:[#allocation15_spill]] %s2045_s18  ;;  %s1567_s24 = sadd.s32 4294967295, %s2065_s23   ;;  %s2065_s23 = sphi %s2124_s23, %s23_s23   ;;  %s2061_s22 = sphi %s2122_s22, %s2544_s22   ;;  %s2057_s21 = sphi %s2120_s21, %s2543_s21   ;;  %s2053_s20 = sphi %s2118_s20, %s2542_s20   ;;  %s2049_s19 = sphi %s2116_s19, %s2541_s19   ;;  %s2045_s18 = sphi %s2114_s18, %s2540_s18  }
   0x9   : > { %s1568_s25 = sadd.s32 4294967294, %s2065_s23   ;;  %p55_p0 = scmp.ne.s32.totalorder %s2049_s19, %s2045_s18 }
   0xa   : > { %p2148_p1 = scmp.eq.s32.totalorder %s1567_s24, 0  ;;  %p2152_p2 = scmp.eq.s32.totalorder %s1567_s24, 1 }
   0xb   : > { %p171_p3 = scmp.eq.s32.totalorder %s1568_s25, 1  ;;  %p1569_p5 = scmp.ge.s32.totalorder %s2065_s23, 1 }
   0xc   : > { %s2522_s26 = scalar_select %p2148_p1, 1, 0 }
   0xd   : > { %s2523_s27 = scalar_select %p2152_p2, 1, 0 }
   0xe   : > { %p2158_p4 = por %p2148_p1, %p55_p0  ;;  %p2163_p6 = por %p171_p3, %p55_p0 }
   0xf   : > { %p178_p7 = scmp.lt.s32.totalorder %s2065_s23, 3  ;;  %s2067_s6 = smov [#allocation5]  }
  0x10   : > { %s2524_s28 = scalar_select %p2158_p4, 1, 0 }
  0x11   : > { %s2525_s29 = scalar_select %p2163_p6, 1, 0 }
  0x12   : > { %p2168_p8 = pnand %p1569_p5, %p178_p7  ;;  %s190_s7 = sshll.u32 %s2067_s6, 4  ;;  %s2172_s7 = int_to_ptr.vmem [resolvable:$true] %s190_s7 }
  0x13   : > { %2526 = sst [smem:[#allocation16_spill]] %s2525_s29  ;;  %s2068_s9 = smov [#allocation7]  }
  0x14   : > { %s2527_s30 = scalar_select %p2168_p8, 1, 0 }
  0x15   : > { %p1756_p9 = pneg %p2168_p8  ;;  %s203_s10 = sshll.u32 %s2068_s9, 4  ;;  %s2183_s10 = int_to_ptr.vmem [resolvable:$true] %s203_s10 }
  0x16   : > { %s2069_s11 = smov [#allocation8]   ;;  %s1861_s15 = scalar_lea.hbm %s2510_s1, 512 }
  0x17   : > { %p2179_p11 = pnand %p1756_p9, %p2148_p1  ;;  %s2185_s12 = sshll.u32 %s2069_s11, 4  ;;  %s217_s12 = int_to_ptr.vmem [resolvable:$true] %s2185_s12 }
  0x18   : > { %p1862_p12 = scmp.ne.s32.totalorder %s2510_s1, %s1861_s15  ;;  %p1868_p5 = scmp.lt.u32.totalorder %s1861_s15, %s2510_s1 }
  0x19   : > { %p2195_p13 = pneg %p2179_p11 }
  0x1b   : > { %p1864_p0 = pnand %p2195_p13, %p1862_p12 }
  0x1d   : > { %p1865_p3 = pneg %p1864_p0 }
  0x1f   : > { %p1870_p7 = pnand %p1868_p5, %p1865_p3 }
  0x21   : > { %1873 = shalt.err (!%p1870_p7)
}
  0x22   : > { %s1874_s9 = scalar_lea.vmem %s2172_s7, 512  ;;  %p1882_p1 = scmp.lt.s32.totalorder %s2172_s7, %s2172_s7 }
  0x23   : > { %p1875_p9 = scmp.ne.s32.totalorder %s2172_s7, %s1874_s9  ;;  %p1883_p4 = scmp.lt.s32.totalorder %s1874_s9, %s1874_s9 }
  0x25   : > { %p1877_p10 = pnand %p1875_p9, %p2195_p13  ;;  %p1884_p12 = por %p1883_p4, %p1882_p1 }
  0x27   : > { %p1878_p6 = pneg %p1877_p10 }
  0x29   : > { %p1885_p0 = pnand %p1884_p12, %p1878_p6 }
  0x2b   : > { %1888 = shalt.err (!%p1885_p0)
}
  0x2c   : > { %s2070_s11 = smov 128   ;;  %s2071_s13 = smov 8  }
  0x2d   : > { %1759 = dma.hbm_to_vmem [thread:$0]  (!%p2179_p11), %s2510_s1, 512, %s2172_s7, [#allocation6], %s2070_s11, %s2070_s11, %s2071_s13  }
  0x2e   : > { %s1889_s25 = scalar_lea.hbm %s2511_s2, 512 }
  0x2f   : > { %p1890_p1 = scmp.ne.s32.totalorder %s2511_s2, %s1889_s25  ;;  %p1896_p10 = scmp.lt.u32.totalorder %s1889_s25, %s2511_s2 }
  0x31   : > { %p1892_p4 = pnand %p1890_p1, %p2195_p13 }
  0x33   : > { %p1893_p6 = pneg %p1892_p4 }
  0x35   : > { %p1898_p3 = pnand %p1896_p10, %p1893_p6 }
  0x37   : > { %1901 = shalt.err (!%p1898_p3)
}
  0x38   : > { %s1902_s7 = scalar_lea.vmem %s2183_s10, 512  ;;  %p1910_p12 = scmp.lt.s32.totalorder %s2183_s10, %s2183_s10 }
  0x39   : > { %p1903_p5 = scmp.ne.s32.totalorder %s2183_s10, %s1902_s7  ;;  %p1911_p0 = scmp.lt.s32.totalorder %s1902_s7, %s1902_s7 }
  0x3b   : > { %p1905_p7 = pnand %p1903_p5, %p2195_p13  ;;  %p1912_p1 = por %p1911_p0, %p1910_p12 }
  0x3d   : > { %p1906_p9 = pneg %p1905_p7 }
  0x3f   : > { %p1913_p4 = pnand %p1912_p1, %p1906_p9 }
  0x41   : > { %1916 = shalt.err (!%p1913_p4)
}
  0x42   : > { %1762 = dma.hbm_to_vmem [thread:$0]  (!%p2179_p11), %s2511_s2, 512, %s2183_s10, [#allocation6], %s2070_s11, %s2070_s11, %s2071_s13  }
  0x43   : > { %s1917_s16 = scalar_lea.hbm %s2512_s3, 512 }
  0x44   : > { %p1918_p6 = scmp.ne.s32.totalorder %s2512_s3, %s1917_s16  ;;  %p1924_p5 = scmp.lt.u32.totalorder %s1917_s16, %s2512_s3 }
  0x46   : > { %p1920_p10 = pnand %p1918_p6, %p2195_p13 }
  0x48   : > { %p1921_p3 = pneg %p1920_p10 }
  0x4a   : > { %p1926_p7 = pnand %p1924_p5, %p1921_p3 }
  0x4c   : > { %1929 = shalt.err (!%p1926_p7)
}
  0x4d   : > { %s1930_s7 = scalar_lea.vmem %s217_s12, 512  ;;  %p1938_p1 = scmp.lt.s32.totalorder %s217_s12, %s217_s12 }
  0x4e   : > { %p1931_p9 = scmp.ne.s32.totalorder %s217_s12, %s1930_s7  ;;  %p1939_p4 = scmp.lt.s32.totalorder %s1930_s7, %s1930_s7 }
  0x50   : > { %p1933_p12 = pnand %p1931_p9, %p2195_p13  ;;  %p1940_p8 = por %p1939_p4, %p1938_p1 }
  0x52   : > { %p1934_p0 = pneg %p1933_p12 }
  0x54   : > { %p1941_p2 = pnand %p1940_p8, %p1934_p0 }
  0x56   : > { %1944 = shalt.err (!%p1941_p2)
}
  0x57   : > { %1765 = dma.hbm_to_vmem [thread:$0]  (!%p2179_p11), %s2512_s3, 512, %s217_s12, [#allocation9], %s2070_s11, %s2070_s11, %s2071_s13  }
  0x58   : > { %s42_s24 = sadd.s32 1, %s2053_s20  ;;  %s35_s8 = sadd.s32 1, %s2061_s22 }
  0x59   : > { %p49_p2 = scmp.ne.s32.totalorder %s2053_s20, %s2049_s19  ;;  %p37_p8 = scmp.ge.s32.totalorder %s35_s8, 2 }
  0x5a   : > { %p50_p13 = scmp.eq.s32.totalorder %s2065_s23, 0  ;;  %p2530_p6 = scmp.ne.s32.totalorder %s2523_s27, 0 }
  0x5b   : > { %p1777_p3 = scmp.lt.s32.totalorder %s2065_s23, 2  ;;  %s2546_s8 = smov (%p37_p8, %s35_s8), 0 }
  0x5c   : > { %p2274_p10 = por %p2530_p6, %p49_p2  ;;  %p51_p5 = por %p50_p13, %p49_p2 }
  0x5d   : > { %s233_s14 = sand.u32 1, %s2053_s20   ;;  %s39_s15 = ssub.s32 %s2061_s22, %s2546_s8 }
  0x5e   : > { %p40_p7 = scmp.eq.s32.totalorder %s39_s15, 0  ;;  %s1574_s12 = sshll.u32 %s233_s14, 3 }
  0x5f   : > { %s1575_s11 = sshll.u32 %s2061_s22, 7  ;;  %s237_s25 = scalar_lea.vmem [#allocation2], %s1574_s12 }
  0x60   : > { %s2286_s13 = scalar_select %p40_p7, %s2053_s20, %s42_s24  }
  0x61   : > { %s2291_s27 = scalar_lea.hbm %s2509_s0, %s1575_s11  ;;  %s244_s6 = sshll.u32 %s237_s25, 4  ;;  %s2293_s6 = int_to_ptr.vmem [resolvable:$true] %s244_s6 }
  0x62   : > { %p2297_p11 = pnand %p1777_p3, %p51_p5  ;;  %s234_s7 = scalar_lea.sflag [#allocation3], %s233_s14 }
  0x63   : > { %s1945_s10 = scalar_lea.hbm %s2291_s27, 128  ;;  %s1950_s15 = scalar_lea.hbm %s2509_s0, 256 }
  0x64   : > { %p1946_p9 = scmp.ne.s32.totalorder %s2291_s27, %s1945_s10  ;;  %p1947_p12 = pneg %p2297_p11 }
  0x65   : > { %p1951_p4 = scmp.lt.u32.totalorder %s2291_s27, %s2509_s0  ;;  %p1952_p2 = scmp.lt.u32.totalorder %s1950_s15, %s1945_s10 }
  0x66   : > { %p1948_p0 = pnand %p1947_p12, %p1946_p9  ;;  %p1954_p13 = scmp.lt.u32.totalorder %s1945_s10, %s2291_s27 }
  0x67   : > { %p1953_p8 = por %p1952_p2, %p1951_p4 }
  0x68   : > { %p1949_p1 = pneg %p1948_p0 }
  0x69   : > { %p1955_p6 = por %p1954_p13, %p1953_p8 }
  0x6b   : > { %p1956_p3 = pnand %p1955_p6, %p1949_p1 }
  0x6d   : > { %1959 = shalt.err (!%p1956_p3)
}
  0x6e   : > { %s1960_s14 = scalar_lea.vmem %s2293_s6, 128  ;;  %s2072_s16 = smov [#allocation2]  }
  0x6f   : > { %p1961_p5 = scmp.ne.s32.totalorder %s2293_s6, %s1960_s14  ;;  %s1965_s17 = sshll.u32 %s2072_s16, 4  ;;  %s1966_s17 = int_to_ptr.vmem [resolvable:$false] %s1965_s17 }
  0x70   : > { %s1967_s25 = scalar_lea.vmem %s1966_s17, 256  ;;  %p1968_p0 = scmp.lt.s32.totalorder %s2293_s6, %s1966_s17 }
  0x71   : > { %p1963_p7 = pnand %p1961_p5, %p1947_p12  ;;  %p1969_p4 = scmp.lt.s32.totalorder %s1967_s25, %s1960_s14 }
  0x73   : > { %p1964_p9 = pneg %p1963_p7  ;;  %p1970_p2 = por %p1969_p4, %p1968_p0 }
  0x75   : > { %p1971_p8 = pnand %p1970_p2, %p1964_p9 }
  0x77   : > { %1974 = shalt.err (!%p1971_p8)
}
  0x78   : > { %1769 = dma.hbm_to_vmem [thread:$0]  (!%p2297_p11), %s2291_s27, 128, %s2293_s6, %s234_s7  }
  0x79   : > { %p2533_p1 = scmp.ne.s32.totalorder %s2527_s30, 0 }
  0x7a   : > { %s2329_s10 = sand.u32 (!%p2533_p1), 1, %s2049_s19   ;;  %p2534_p12 = scmp.ne.s32.totalorder (!%p2533_p1), %s2524_s28, 0 }
  0x7b   : > { %253 = sbr.rel (%p2533_p1) target bundleno = 2401 (0x961), region = 40  ;;  %s1577_s18 = sshll.u32 (!%p2533_p1), %s2329_s10, 3 }
  0x7c   : > { %s256_s24 = scalar_lea.sflag (!%p2533_p1), [#allocation3], %s2329_s10  ;;  %s2335_s15 = scalar_lea.vmem (!%p2533_p1), [#allocation2], %s1577_s18 }
  0x82   : > { %2028 = dma.done.wait (%p2534_p12), %s256_s24, 128  }
  0x83   : > { %2030 = vsyncadd (%p2534_p12), %s256_s24, 4294967168  ;;  %p2535_p11 = scmp.ne.s32.totalorder %s2522_s26, 0 }
  0x85   : > { %2032 = dma.done.wait (%p2535_p11), [#allocation6], 1024  }
  0x86   : > { %2034 = vsyncadd (%p2535_p11), [#allocation6], 4294966272 }
  0x87   : > { %2036 = dma.done.wait (%p2535_p11), [#allocation9], 512  }
  0x88   : > { %2038 = vsyncadd (%p2535_p11), [#allocation9], 4294966784  ;;  %v2073_v0 = vmov 0.0|0.0   ;;  %vm2074_vm0 = vmmov 0   ;;  %v2075_v1 = vmov 0.0   ;;  %v380_v2 = vld [vmem:[#allocation7] sm:$0xff]  ;;  %v457_v20 = vlaneseq }
  0x89   : > { %1727 = vmatprep.subr.bf16.mxu1 %v2073_v0  ;;  %1721 = vmatprep.subr.bf16.mxu0 %v2073_v0  ;;  %v381_v3 = vld [vmem:[#allocation7 + $0x8] sm:$0xff]  ;;  %v302_v4 = vld [vmem:[#allocation5] sm:$0xff]  ;;  %v382_v7 = vld [vmem:[#allocation7 + $0x10] sm:$0xff]  ;;  %vm306_vm1 = vcmask 261120   ;;  %vm471_vm2 = vcmask 64512   ;;  %s2076_s26 = smov 96  }
  0x8a   : > { %1658 = vmatprep.mubr.msk.f32.mxu1 %vm2074_vm0, %v2075_v1  ;;  %1647 = vmatprep.mubr.msk.f32.mxu0 %vm2074_vm0, %v2075_v1  ;;  %v1728_v5 = vpack.c.bf16 %v381_v3, %v380_v2  ;;  %v303_v6 = vld [vmem:[#allocation5 + $0x8] sm:$0xff]  ;;  %v383_v8 = vld [vmem:[#allocation7 + $0x18] sm:$0xff]  ;;  %v304_v10 = vld [vmem:[#allocation5 + $0x10] sm:$0xff]  ;;  %s2077_s28 = smov 120   ;;  %s2078_s30 = smov 112   ;;  %v2378_v21 = vshrl.u32 %v457_v20, 7 }
  0x8b   : > { %v1722_v9 = vpack.c.bf16 %v303_v6, %v302_v4  ;;  %v305_v11 = vld [vmem:[#allocation5 + $0x18] sm:$0xff]  ;;  %v1731_v12 = vpack.c.bf16 %v383_v8, %v382_v7  ;;  %v2380_v22 = vand.u32 127, %v457_v20  ;;  %v637_v40 = vld [vmem:[#allocation8] sm:$0xff]  ;;  %s2079_s27 = smov 80   ;;  %s2080_s6 = smov 104  }
  0x8c   : > { %1729 = vmatpush3.bf16.msra.mxu1 %v1728_v5  ;;  %v1725_v13 = vpack.c.bf16 %v305_v11, %v304_v10  ;;  %v298_v14 = vld [vmem:[%s2335_s15] sm:$0xff]  ;;  %s2081_s9 = smov 88   ;;  %v880_v10 = vld [vmem:[#allocation8 + $0x8] sm:$0xff]  ;;  %s2082_s7 = smov 72  }
  0x8d   : > { %1723 = vmatpush3.bf16.msra.mxu0 %v1722_v9  ;;  %1730 = vmatprep.subr.bf16.mxu1 %v2073_v0  ;;  %vm463_vm3 = vcmp.le.s32.totalorder %v2380_v22, %v2378_v21  ;;  %s1602_s14 = sshll.u32 %s2057_s21, 7  ;;  %s297_s16 = scalar_lea.vmem [#allocation10], %s1577_s18 }
  0x8e   : > { %1724 = vmatprep.subr.bf16.mxu0 %v2073_v0  ;;  %s1457_s17 = sshll.u32 %s297_s16, 4  ;;  %s2459_s15 = scalar_lea.hbm %s2514_s5, %s1602_s14  ;;  %s2461_s17 = int_to_ptr.vmem [resolvable:$true] %s1457_s17 }
  0x8f   : > { %s1975_s21 = scalar_lea.vmem %s2461_s17, 128  ;;  %s2083_s18 = smov [#allocation10]  }
  0x90   : > { %1732 = vmatpush3.bf16.msra.mxu1 %v1731_v12  ;;  %p1976_p13 = scmp.ne.s32.totalorder %s2461_s17, %s1975_s21 }
  0x91   : > { %1726 = vmatpush3.bf16.msra.mxu0 %v1725_v13  ;;  %1661 = vmatprep.subr.mxu1 %v2075_v1 }
  0x92   : > { %1671 = vmatprep.subr.mxu0 %v2075_v1  ;;  %p1977_p6 = pnand %p1976_p13, %p2274_p10 }
  0x93   : > { %1659 = vmatmul.mubr.msk.f32.vlgmr.msra.gmra.mrb[0].mxu1 %vm306_vm1, %v298_v14 }
  0x94   : > { %1648 = vmatmul.mubr.msk.f32.vlgmr.msra.gmra.mrb[0].mxu0 %vm306_vm1, %v298_v14  ;;  %1663 = vmatprep.mubr.msk.f32.mxu1 %vm2074_vm0, %v2075_v1  ;;  %p1978_p3 = pneg %p1977_p6 }
  0x95   : > { %1673 = vmatprep.mubr.msk.f32.mxu0 %vm2074_vm0, %v2075_v1  ;;  %1672 = vmatpush3.msra.mxu0 %v637_v40 }
  0x96   : > { %1681 = vmatprep.subr.mxu0 %v2075_v1 }
 0x166   : > { %v2362_v15 = vpop.f32.mrb[0].mxu1 }
 0x167   : > { %561 = vrot.lane.b32.xlu1 %v2362_v15, %s2076_s26  ;;  %v1660_v16 = vpop.f32.mrb[1].mxu1  ;;  %1662 = vmatpush3.xpose.msk.msra.mxu1 %vm471_vm2, %v2362_v15  ;;  %v2367_v17 = vpop.f32.mrb[0].mxu0  ;;  %s1443_s26 = scalar_lea.sflag [#allocation4], %s2329_s10 }
 0x168   : > { %v1649_v18 = vpop.f32.mrb[1].mxu0  ;;  %1666 = vmatprep.subr.mxu1 %v2075_v1 }
 0x16a   : > { %1664 = vmatmul.mubr.msk.f32.vlgmr.msra.gmra.mrb[2].mxu1 %vm471_vm2, %v2367_v17 }
 0x16b   : > { %714 = vrot.lane.b32.xlu1 %v2362_v15, %s2077_s28  ;;  %1668 = vmatprep.mubr.msk.f32.mxu1 %vm2074_vm0, %v2075_v1 }
 0x16f   : > { %957 = vrot.lane.b32.xlu1 %v2362_v15, %s2078_s30 }
 0x173   : > { %955 = vrot.lane.b32.xlu1 %v2367_v17, %s2078_s30 }
 0x1d9   : > { %v562_v19 = vpop.permute.xlu1 %561 }
 0x1da   : > { %1667 = vmatpush3.msra.mxu1 %v562_v19  ;;  %v1123_v19 = vld [vmem:[#allocation8 + $0x10] sm:$0xff] }
 0x1db   : > { %1676 = vmatprep.subr.mxu1 %v2075_v1 }
 0x1dd   : > { %v715_v34 = vpop.permute.xlu1 %714 }
 0x1e1   : > { %v958_v37 = vpop.permute.xlu1 %957 }
 0x1e5   : > { %v956_v39 = vpop.permute.xlu1 %955 }
 0x23d   : > { %v544_v23 = vpop.f32.mrb[2].mxu1 }
 0x23e   : > { %v548_v24 = vmul.f32 0.35355338, %v544_v23  ;;  %v1665_v25 = vpop.f32.mrb[3].mxu1 }
 0x240   : > { %v549_v26 = vsel %vm463_vm3, %v548_v24, -1e+30 }
 0x241   : > { %v550_v27 = vsel %vm471_vm2, %v549_v26, -inf }
 0x242   : > { %551 = vmax.xlane.f32.xlu0 %v550_v27 }
 0x2cf   : > { %v552_v28 = vpop.xlane.xlu0 %551 }
 0x2d0   : > { %v553_v29 = vsub.f32 %v549_v26, %v552_v28 }
 0x2d2   : > { %v554_v30 = vmul.f32 1.442695, %v553_v29 }
 0x2d4   : > { %1845 = vpow2.f32 %v554_v30 }
 0x2de   : > { %v1846_v31 = vpop.eup %1845 }
 0x2df   : > { %v556_v32 = vsel %vm471_vm2, %v1846_v31, 0.0 }
 0x2e0   : > { %557 = vadd.xlane.f32.xlu0 %v556_v32 }
 0x2f6   : > { %712 = vrot.lane.b32.xlu0 %v2367_v17, %s2077_s28  ;;  %s1979_s28 = sshll.u32 %s2083_s18, 4  ;;  %s1980_s28 = int_to_ptr.vmem [resolvable:$false] %s1979_s28 }
 0x2f7   : > { %s1981_s30 = scalar_lea.vmem %s1980_s28, 256  ;;  %p1982_p5 = scmp.lt.s32.totalorder %s2461_s17, %s1980_s28 }
 0x2f8   : > { %p1983_p7 = scmp.lt.s32.totalorder %s1981_s30, %s1975_s21 }
 0x2fa   : > { %p1984_p9 = por %p1983_p7, %p1982_p5 }
 0x2fc   : > { %p1985_p0 = pnand %p1984_p9, %p1978_p3 }
 0x36d   : > { %v558_v33 = vpop.xlane.xlu0 %557 }
 0x36e   : > { %1847 = vrcp.f32 %v558_v33  ;;  %v1584_v33 = vld [vmem:[%s2513_s4] ss:$0 sm:$0xff] }
 0x371   : > { %v713_v38 = vpop.permute.xlu0 %712 }
 0x378   : > { %v1848_v35 = vpop.eup %1847 }
 0x379   : > { %v560_v36 = vmul.f32 %v1848_v35, %v1846_v31  ;;  %v1366_v31 = vld [vmem:[#allocation8 + $0x18] sm:$0xff] }
 0x37b   : > { %1669 = vmatmul.mubr.msk.f32.vlgmr.msra.gmra.mrb[4].mxu1 %vm471_vm2, %v560_v36 }
 0x37c   : > { %1677 = vmatpush3.xpose.msk.msra.mxu1 %vm471_vm2, %v715_v34  ;;  %1678 = vmatprep.mubr.msk.f32.mxu1 %vm2074_vm0, %v2075_v1 }
 0x37d   : > { %1691 = vmatprep.subr.mxu1 %v2075_v1 }
 0x37f   : > { %1679 = vmatmul.mubr.msk.f32.vlgmr.msra.gmra.mrb[6].mxu1 %vm471_vm2, %v713_v38 }
 0x380   : > { %1692 = vmatpush3.xpose.msk.msra.mxu1 %vm471_vm2, %v958_v37  ;;  %1693 = vmatprep.mubr.msk.f32.mxu1 %vm2074_vm0, %v2075_v1 }
 0x381   : > { %1696 = vmatprep.subr.mxu1 %v2075_v1 }
 0x383   : > { %1694 = vmatmul.mubr.msk.f32.vlgmr.msra.gmra.mrb[8].mxu1 %vm471_vm2, %v956_v39 }
 0x384   : > { %1698 = vmatprep.mubr.msk.f32.mxu1 %vm2074_vm0, %v2075_v1 }
 0x44e   : > { %v633_v41 = vpop.f32.mrb[4].mxu1 }
 0x44f   : > { %v1670_v42 = vpop.f32.mrb[5].mxu1  ;;  %1674 = vmatmul.mubr.msk.f32.vlgmr.msra.gmra.mrb[2].mxu0 %vm471_vm2, %v633_v41 }
 0x450   : > { %1683 = vmatprep.mubr.msk.f32.mxu0 %vm2074_vm0, %v2075_v1 }
 0x452   : > { %v786_v43 = vpop.f32.mrb[6].mxu1 }
 0x453   : > { %v1680_v44 = vpop.f32.mrb[7].mxu1  ;;  %v790_v50 = vmul.f32 0.35355338, %v786_v43 }
 0x455   : > { %v791_v51 = vsel %vm463_vm3, %v790_v50, -1e+30 }
 0x456   : > { %v1029_v45 = vpop.f32.mrb[8].mxu1  ;;  %v792_v52 = vsel %vm471_vm2, %v791_v51, -inf }
 0x457   : > { %v1033_v46 = vmul.f32 0.35355338, %v1029_v45  ;;  %v1695_v47 = vpop.f32.mrb[9].mxu1 }
 0x459   : > { %v1034_v48 = vsel %vm463_vm3, %v1033_v46, -1e+30 }
 0x45a   : > { %v1035_v49 = vsel %vm471_vm2, %v1034_v48, -inf }
 0x45b   : > { %1036 = vmax.xlane.f32.xlu1 %v1035_v49 }
 0x46c   : > { %1046 = vrot.lane.b32.xlu1 %v2362_v15, %s2079_s27 }
 0x470   : > { %1198 = vrot.lane.b32.xlu1 %v2367_v17, %s2080_s6 }
 0x494   : > { %793 = vmax.xlane.f32.xlu1 %v792_v52 }
 0x4a5   : > { %803 = vrot.lane.b32.xlu1 %v2362_v15, %s2081_s9 }
 0x4e8   : > { %v1037_v53 = vpop.xlane.xlu1 %1036 }
 0x4e9   : > { %v1038_v54 = vsub.f32 %v1034_v48, %v1037_v53 }
 0x4eb   : > { %v1039_v55 = vmul.f32 1.442695, %v1038_v54 }
 0x4ec   : > { %v1047_v56 = vpop.permute.xlu1 %1046 }
 0x4ed   : > { %1849 = vpow2.f32 %v1039_v55  ;;  %1697 = vmatpush3.msra.mxu1 %v1047_v56 }
 0x4ee   : > { %1706 = vmatprep.subr.mxu1 %v2075_v1 }
 0x4f0   : > { %v1199_v59 = vpop.permute.xlu1 %1198 }
 0x4f7   : > { %v1850_v57 = vpop.eup %1849 }
 0x4f8   : > { %v1041_v58 = vsel %vm471_vm2, %v1850_v57, 0.0 }
 0x4f9   : > { %1042 = vadd.xlane.f32.xlu0 %v1041_v58 }
 0x50f   : > { %1200 = vrot.lane.b32.xlu0 %v2362_v15, %s2080_s6 }
 0x521   : > { %v794_v60 = vpop.xlane.xlu1 %793 }
 0x522   : > { %v795_v61 = vsub.f32 %v791_v51, %v794_v60 }
 0x524   : > { %v796_v62 = vmul.f32 1.442695, %v795_v61 }
 0x525   : > { %v804_v63 = vpop.permute.xlu1 %803 }
 0x526   : > { %1851 = vpow2.f32 %v796_v62  ;;  %1682 = vmatpush3.msra.mxu0 %v804_v63 }
 0x527   : > { %1686 = vmatprep.subr.mxu0 %v2075_v1 }
 0x530   : > { %v1852_v0 = vpop.eup %1851 }
 0x531   : > { %v798_v2 = vsel %vm471_vm2, %v1852_v0, 0.0 }
 0x532   : > { %799 = vadd.xlane.f32.xlu0 %v798_v2 }
 0x586   : > { %v1043_v3 = vpop.xlane.xlu0 %1042 }
 0x587   : > { %1853 = vrcp.f32 %v1043_v3 }
 0x58a   : > { %v1201_v6 = vpop.permute.xlu0 %1200 }
 0x591   : > { %v1854_v4 = vpop.eup %1853 }
 0x592   : > { %v1045_v5 = vmul.f32 %v1854_v4, %v1850_v57 }
 0x594   : > { %1699 = vmatmul.mubr.msk.f32.vlgmr.msra.gmra.mrb[10].mxu1 %vm471_vm2, %v1045_v5 }
 0x595   : > { %1707 = vmatpush3.xpose.msk.msra.mxu1 %vm471_vm2, %v1201_v6  ;;  %1708 = vmatprep.mubr.msk.f32.mxu1 %vm2074_vm0, %v2075_v1 }
 0x598   : > { %1709 = vmatmul.mubr.msk.f32.vlgmr.msra.gmra.mrb[12].mxu1 %vm471_vm2, %v1199_v59 }
 0x5bf   : > { %v800_v7 = vpop.xlane.xlu0 %799 }
 0x5c0   : > { %1855 = vrcp.f32 %v800_v7 }
 0x5ca   : > { %v1856_v8 = vpop.eup %1855 }
 0x5cb   : > { %v802_v9 = vmul.f32 %v1856_v8, %v1852_v0 }
 0x5cd   : > { %1684 = vmatmul.mubr.msk.f32.vlgmr.msra.gmra.mrb[4].mxu0 %vm471_vm2, %v802_v9 }
 0x5ce   : > { %1688 = vmatprep.mubr.msk.f32.mxu0 %vm2074_vm0, %v2075_v1  ;;  %1687 = vmatpush3.msra.mxu0 %v880_v10 }
 0x5cf   : > { %1701 = vmatprep.subr.mxu0 %v2075_v1 }
 0x667   : > { %v1118_v11 = vpop.f32.mrb[10].mxu1 }
 0x668   : > { %v1700_v12 = vpop.f32.mrb[11].mxu1 }
 0x66b   : > { %v1272_v13 = vpop.f32.mrb[12].mxu1 }
 0x66c   : > { %v1276_v14 = vmul.f32 0.35355338, %v1272_v13  ;;  %v1710_v16 = vpop.f32.mrb[13].mxu1 }
 0x66e   : > { %v1277_v17 = vsel %vm463_vm3, %v1276_v14, -1e+30 }
 0x66f   : > { %v1278_v18 = vsel %vm471_vm2, %v1277_v17, -inf }
 0x670   : > { %1279 = vmax.xlane.f32.xlu0 %v1278_v18 }
 0x6a0   : > { %v875_v20 = vpop.f32.mrb[4].mxu0 }
 0x6a1   : > { %v1685_v23 = vpop.f32.mrb[5].mxu0  ;;  %1689 = vmatmul.mubr.msk.f32.vlgmr.msra.gmra.mrb[2].mxu0 %vm471_vm2, %v875_v20 }
 0x6a2   : > { %1702 = vmatpush3.msra.mxu0 %v1123_v19  ;;  %1703 = vmatprep.mubr.msk.f32.mxu0 %vm2074_vm0, %v2075_v1 }
 0x6a3   : > { %1711 = vmatprep.subr.mxu0 %v2075_v1 }
 0x6a9   : > { %1704 = vmatmul.mubr.msk.f32.vlgmr.msra.gmra.mrb[2].mxu0 %vm471_vm2, %v1118_v11 }
 0x6aa   : > { %1713 = vmatprep.mubr.msk.f32.mxu0 %vm2074_vm0, %v2075_v1 }
 0x6fd   : > { %v1280_v21 = vpop.xlane.xlu0 %1279 }
 0x6fe   : > { %v1281_v22 = vsub.f32 %v1277_v17, %v1280_v21 }
 0x700   : > { %v1282_v24 = vmul.f32 1.442695, %v1281_v22 }
 0x702   : > { %1857 = vpow2.f32 %v1282_v24 }
 0x70c   : > { %v1858_v25 = vpop.eup %1857 }
 0x70d   : > { %v1284_v26 = vsel %vm471_vm2, %v1858_v25, 0.0 }
 0x70e   : > { %1285 = vadd.xlane.f32.xlu0 %v1284_v26 }
 0x724   : > { %1289 = vrot.lane.b32.xlu0 %v2362_v15, %s2082_s7 }
 0x79b   : > { %v1286_v27 = vpop.xlane.xlu0 %1285 }
 0x79c   : > { %1859 = vrcp.f32 %v1286_v27 }
 0x79f   : > { %v1290_v28 = vpop.permute.xlu0 %1289 }
 0x7a0   : > { %1712 = vmatpush3.msra.mxu0 %v1290_v28 }
 0x7a1   : > { %1716 = vmatprep.subr.mxu0 %v2075_v1 }
 0x7a6   : > { %v1860_v29 = vpop.eup %1859 }
 0x7a7   : > { %v1288_v30 = vmul.f32 %v1860_v29, %v1858_v25 }
 0x7a9   : > { %1714 = vmatmul.mubr.msk.f32.vlgmr.msra.gmra.mrb[6].mxu0 %vm471_vm2, %v1288_v30 }
 0x7aa   : > { %1717 = vmatpush3.msra.mxu0 %v1366_v31  ;;  %1718 = vmatprep.mubr.msk.f32.mxu0 %vm2074_vm0, %v2075_v1 }
 0x87c   : > { %v1361_v32 = vpop.f32.mrb[6].mxu0 }
 0x87d   : > { %v1715_v15 = vpop.f32.mrb[7].mxu0  ;;  %1719 = vmatmul.mubr.msk.f32.vlgmr.msra.gmra.mrb[2].mxu0 %vm471_vm2, %v1361_v32 }
 0x950   : > { %v1436_v34 = vpop.f32.mrb[2].mxu0 }
 0x951   : > { %v1733_v35 = vadd.f32 %v1584_v33, %v1436_v34  ;;  %v1720_v36 = vpop.f32.mrb[3].mxu0 }
 0x953   : > { %1441 = vst.msk [vmem:[%s297_s16] sm:$0xff] %vm306_vm1, %v1733_v35 }
 0x954   : > { %1988 = shalt.err (!%p1985_p0)
}
 0x955   : > { %s1989_s10 = scalar_lea.hbm %s2459_s15, 128  ;;  %s1993_s9 = scalar_lea.hbm %s2514_s5, 256 }
 0x956   : > { %p1990_p4 = scmp.ne.s32.totalorder %s2459_s15, %s1989_s10  ;;  %p1994_p1 = scmp.lt.u32.totalorder %s2459_s15, %s2514_s5 }
 0x957   : > { %p1995_p12 = scmp.lt.u32.totalorder %s1993_s9, %s1989_s10  ;;  %p1997_p13 = scmp.lt.u32.totalorder %s1989_s10, %s2459_s15 }
 0x958   : > { %p1991_p2 = pnand %p1990_p4, %p2274_p10 }
 0x959   : > { %p1996_p11 = por %p1995_p12, %p1994_p1 }
 0x95a   : > { %p1992_p8 = pneg %p1991_p2 }
 0x95b   : > { %p1998_p6 = por %p1997_p13, %p1996_p11 }
 0x95d   : > { %p1999_p3 = pnand %p1998_p6, %p1992_p8 }
 0x95f   : > { %2002 = shalt.err (!%p1999_p3)
}
 0x960   : > { %1754 = dma.vmem_to_hbm [thread:$0]  (%p2274_p10), %s2461_s17, 128, %s2459_s15, %s1443_s26  }
 0x961 PF: > { %s2536_s11 = sld [smem:[#allocation15_spill]]  ;;  %s2537_s14 = sld [smem:[#allocation16_spill]] }
 0x962   : > { %p2539_p7 = scmp.ge.s32.totalorder %s2065_s23, 2 }
 0x967   : > { %s1469_s16 = sand.u32 1, %s2536_s11   ;;  %p2538_p5 = scmp.ne.s32.totalorder %s2537_s14, 0 }
 0x968   : > { %s1470_s25 = scalar_lea.sflag [#allocation4], %s1469_s16 }
 0x969   : > { %p1771_p9 = pnand %p2539_p7, %p2538_p5 }
 0x96b   : > { %2040 = dma.done.wait (!%p1771_p9), %s1470_s25, 128  }
 0x96c   : > { %2042 = vsyncadd (!%p1771_p9), %s1470_s25, 4294967168  ;;  %s23_s23 = sadd.s32 1, %s2065_s23   ;;  %s2540_s18 = smov %s2049_s19 }
 0x96d   : > { %p20_p0 = scmp.ge.s32.totalorder %s23_s23, 4   ;;  %s2541_s19 = smov %s2053_s20 }
 0x96e   : > { %s2542_s20 = smov %s2286_s13  ;;  %s2543_s21 = smov %s2061_s22 }
 0x96f   : > { %s2544_s22 = smov %s2546_s8  ;;  %22 = sbr.rel (!%p20_p0) target bundleno = 8 (0x8), region = 101 }
 0x976   :  { %1475 = vsyncpa [#allocation3], 1 }
 0x977   :  { %1477 = vsyncpa [#allocation3 + $0x1], 1 }
 0x978   :  { %1478 = vsyncpa [#allocation6], 1 }
 0x979   :  { %1479 = vsyncpa [#allocation9], 1 }
 0x97a   :  { %1480 = vsyncpa [#allocation4], 1 }
 0x97b   :  { %1482 = vsyncpa [#allocation4 + $0x1], 1 }

</bundles_post_ra>
